<compile_context>
chip_gen: v7x
topology: tpu7x:2x2x1
jax: 0.10.0
libtpu: 0.0.40
codegen_flags: <defaults>
</compile_context>

<pallas_src>
import functools

import jax
import jax.numpy as jnp
from jax.experimental import pallas as pl
from jax.experimental.pallas import tpu as pltpu

H1 = 128   # hidden size of lstm1 (hard-coded in the PyTorch module)
HP = 128   # lane-padded hidden size used for lstm2 inside the kernel


def mann_kernel(x_ref, wc1_ref, b1_ref, wc2_ref, b2_ref, out_ref, *, num_classes):
    """Runs both LSTM layers over the full sequence in one invocation."""
    T, B, _ = x_ref.shape
    C = num_classes

    # ---- loop-invariant loads / broadcasts, hoisted out of the recurrence ----
    wc1 = wc1_ref[...]                                   # (in_pad + H1, 4*H1) bf16
    wc2 = wc2_ref[...]                                   # (H1 + HP,  4*HP)    bf16
    b1 = jnp.broadcast_to(b1_ref[...], (B, 4 * H1))      # (B, 512) f32
    b2 = jnp.broadcast_to(b2_ref[...], (B, 4 * HP))      # (B, 512) f32

    def step1(x_t, h, c):
        # one fused MXU dot: [x_t, h] @ [W_ih1^T ; W_hh1^T]  (contraction = 2*128)
        xh = jnp.concatenate([x_t, h.astype(jnp.bfloat16)], axis=-1)
        g = jnp.dot(xh, wc1, preferred_element_type=jnp.float32) + b1
        i = jax.nn.sigmoid(g[:, 0 * H1:1 * H1])
        f = jax.nn.sigmoid(g[:, 1 * H1:2 * H1])
        gg = jnp.tanh(g[:, 2 * H1:3 * H1])
        o = jax.nn.sigmoid(g[:, 3 * H1:4 * H1])
        c_new = f * c + i * gg
        h_new = o * jnp.tanh(c_new)
        return h_new, c_new

    def step2(h_in, h, c):
        # gate blocks are padded to 128 lanes -> all slices are lane-aligned.
        hh = jnp.concatenate(
            [h_in.astype(jnp.bfloat16), h.astype(jnp.bfloat16)], axis=-1)
        g = jnp.dot(hh, wc2, preferred_element_type=jnp.float32) + b2
        i = jax.nn.sigmoid(g[:, 0 * HP:1 * HP])
        f = jax.nn.sigmoid(g[:, 1 * HP:2 * HP])
        gg = jnp.tanh(g[:, 2 * HP:3 * HP])
        o = jax.nn.sigmoid(g[:, 3 * HP:4 * HP])
        c_new = f * c + i * gg
        h_new = o * jnp.tanh(c_new)
        return h_new, c_new

    # zero initial state (PyTorch default when hx is None); lives in the carry.
    h1 = jnp.zeros((B, H1), jnp.float32)
    c1 = jnp.zeros((B, H1), jnp.float32)
    h2 = jnp.zeros((B, HP), jnp.float32)
    c2 = jnp.zeros((B, HP), jnp.float32)

    # Skewed (software-pipelined) loop: inside one iteration, layer1 step t+1
    # and layer2 step t share no data dependency, so their MXU / VPU / EUP work
    # can interleave in the VLIW schedule.
    h1, c1 = step1(x_ref[0], h1, c1)                     # prologue: layer1 @ t=0

    def body(t, carry):
        h1, c1, h2, c2 = carry
        h1n, c1n = step1(x_ref[t + 1], h1, c1)           # layer1, step t+1
        h2n, c2n = step2(h1, h2, c2)                     # layer2, step t

        @pl.when(t >= T - C)                             # only needed timesteps
        def _():
            out_ref[t - (T - C)] = h2n                   # lane-dense (B, HP) store

        return (h1n, c1n, h2n, c2n)

    h1, c1, h2, c2 = jax.lax.fori_loop(0, T - 1, body, (h1, c1, h2, c2))

    h2, c2 = step2(h1, h2, c2)                           # epilogue: layer2 @ t=T-1
    out_ref[C - 1] = h2


def pack_mann_params(wih1, whh1, bih1, bhh1, wih2, whh2, bih2, bhh2, num_classes):
    """Pre-transpose / stack / lane-pad PyTorch-layout LSTM weights for the kernel."""
    C = num_classes
    in_dim = wih1.shape[1]
    in_pad = ((in_dim + 127) // 128) * 128

    # layer 1: [W_ih1^T (rows padded to in_pad) ; W_hh1^T] -> (in_pad + H1, 4*H1)
    wih1_t = jnp.zeros((in_pad, 4 * H1), jnp.float32).at[:in_dim].set(wih1.T)
    wc1 = jnp.concatenate([wih1_t, whh1.T], axis=0).astype(jnp.bfloat16)
    b1 = (bih1 + bhh1)[None, :].astype(jnp.float32)

    # layer 2: pad every gate block from C to HP lanes so in-kernel slices are
    # 128-lane aligned; zero-pad the recurrent rows so the garbage lanes of the
    # padded hidden state never contribute to the real gates.
    wc2 = jnp.zeros((H1 + HP, 4 * HP), jnp.float32)
    b2 = jnp.zeros((4 * HP,), jnp.float32)
    wih2_t, whh2_t, bsum2 = wih2.T, whh2.T, bih2 + bhh2
    for k in range(4):
        wc2 = wc2.at[:H1, k * HP:k * HP + C].set(wih2_t[:, k * C:(k + 1) * C])
        wc2 = wc2.at[H1:H1 + C, k * HP:k * HP + C].set(whh2_t[:, k * C:(k + 1) * C])
        b2 = b2.at[k * HP:k * HP + C].set(bsum2[k * C:(k + 1) * C])
    return wc1, b1, wc2.astype(jnp.bfloat16), b2[None, :], in_pad


def mann_forward(x, packed_params, num_classes):
    """x: (T, B, embed + num_classes) f32 -> (B * num_classes, num_classes)."""
    T, B, in_dim = x.shape
    C = num_classes
    assert T >= C, "sequence length must be >= num_classes"
    wc1, b1, wc2, b2, in_pad = packed_params

    # lane-pad + bf16-cast the input once in the wrapper (MXU operand dtype).
    x_pad = jnp.zeros((T, B, in_pad), jnp.float32).at[..., :in_dim].set(x)
    x_pad = x_pad.astype(jnp.bfloat16)

    out = pl.pallas_call(
        functools.partial(mann_kernel, num_classes=C),
        out_shape=jax.ShapeDtypeStruct((C, B, HP), jnp.float32),
        in_specs=[pl.BlockSpec(memory_space=pltpu.MemorySpace.VMEM)] * 5,
        out_specs=pl.BlockSpec(memory_space=pltpu.MemorySpace.VMEM),
    )(x_pad, wc1, b1, wc2, b2)

    # glue: x[-C:].transpose(0, 1).reshape(-1, C)
    return jnp.transpose(out[..., :C], (1, 0, 2)).reshape(-1, C)


# ----------------------------- pure-JAX reference -----------------------------
def _lstm_layer_ref(x, w_ih, w_hh, b_ih, b_hh, hid):
    """Natural (unpacked) LSTM layer; bf16 MXU operands / f32 accum like the kernel."""
    T, B, _ = x.shape
    wiht = w_ih.T.astype(jnp.bfloat16)
    whht = w_hh.T.astype(jnp.bfloat16)
    b = (b_ih + b_hh)[None, :]

    def step(carry, x_t):
        h, c = carry
        gates = (jnp.dot(x_t.astype(jnp.bfloat16), wiht,
                         preferred_element_type=jnp.float32)
                 + jnp.dot(h.astype(jnp.bfloat16), whht,
                           preferred_element_type=jnp.float32)
                 + b)
        i = jax.nn.sigmoid(gates[:, :hid])
        f = jax.nn.sigmoid(gates[:, hid:2 * hid])
        g = jnp.tanh(gates[:, 2 * hid:3 * hid])
        o = jax.nn.sigmoid(gates[:, 3 * hid:4 * hid])
        c = f * c + i * g
        h = o * jnp.tanh(c)
        return (h, c), h

    init = (jnp.zeros((B, hid), jnp.float32), jnp.zeros((B, hid), jnp.float32))
    _, hs = jax.lax.scan(step, init, x)
    return hs


if __name__ == "__main__":
    # small shapes consistent with the module's forward
    num_classes, num_samples, embed_size = 4, 2, 32
    B = 2
    T = num_classes * num_samples            # seq len (>= num_classes)
    in_dim = embed_size + num_classes

    key = jax.random.PRNGKey(0)
    ks = jax.random.split(key, 9)
    k1 = float(1.0 / jnp.sqrt(H1))
    k2 = float(1.0 / jnp.sqrt(num_classes))

    # PyTorch nn.LSTM-style params: uniform(-1/sqrt(hidden), 1/sqrt(hidden))
    wih1 = jax.random.uniform(ks[0], (4 * H1, in_dim), jnp.float32, -k1, k1)
    whh1 = jax.random.uniform(ks[1], (4 * H1, H1), jnp.float32, -k1, k1)
    bih1 = jax.random.uniform(ks[2], (4 * H1,), jnp.float32, -k1, k1)
    bhh1 = jax.random.uniform(ks[3], (4 * H1,), jnp.float32, -k1, k1)
    wih2 = jax.random.uniform(ks[4], (4 * num_classes, H1), jnp.float32, -k2, k2)
    whh2 = jax.random.uniform(ks[5], (4 * num_classes, num_classes), jnp.float32, -k2, k2)
    bih2 = jax.random.uniform(ks[6], (4 * num_classes,), jnp.float32, -k2, k2)
    bhh2 = jax.random.uniform(ks[7], (4 * num_classes,), jnp.float32, -k2, k2)

    x = jax.random.normal(ks[8], (T, B, in_dim), jnp.float32)

    packed = pack_mann_params(wih1, whh1, bih1, bhh1,
                              wih2, whh2, bih2, bhh2, num_classes)

    out = jax.block_until_ready(mann_forward(x, packed, num_classes))

    # check against pure-JAX reference (bf16 operands, tolerance relaxed vs f32)
    h1_seq = _lstm_layer_ref(x, wih1, whh1, bih1, bhh1, H1)
    h2_seq = _lstm_layer_ref(h1_seq, wih2, whh2, bih2, bhh2, num_classes)
    ref = jnp.transpose(h2_seq[-num_classes:], (1, 0, 2)).reshape(-1, num_classes)

    assert out.shape == (B * num_classes, num_classes), out.shape
    assert jnp.allclose(out, ref, atol=1e-2, rtol=1e-2), (
        "mismatch vs reference: max abs diff = %g" % float(jnp.max(jnp.abs(out - ref))))
    print("KERNEL_OK")
</pallas_src>

<mosaic_0001>
module attributes {stable_mosaic.version = 11 : i64} {
  func.func @mann_kernel(%arg0: memref<8x2x128xbf16, #tpu.memory_space<vmem>>, %arg1: memref<256x512xbf16, #tpu.memory_space<vmem>>, %arg2: memref<1x512xf32, #tpu.memory_space<vmem>>, %arg3: memref<256x512xbf16, #tpu.memory_space<vmem>>, %arg4: memref<1x512xf32, #tpu.memory_space<vmem>>, %arg5: memref<4x2x128xf32, #tpu.memory_space<vmem>>) attributes {dimension_semantics = [], scalar_prefetch = 0 : i64, scratch_operands = 0 : i64, tpu.core_type = #tpu.core_type<tc>} {
    %c0 = arith.constant 0 : index
    %c0_0 = arith.constant 0 : index
    %0 = vector.load %arg1[%c0, %c0_0] : memref<256x512xbf16, #tpu.memory_space<vmem>>, vector<256x512xbf16>
    %c0_1 = arith.constant 0 : index
    %c0_2 = arith.constant 0 : index
    %1 = vector.load %arg3[%c0_1, %c0_2] : memref<256x512xbf16, #tpu.memory_space<vmem>>, vector<256x512xbf16>
    %c0_3 = arith.constant 0 : index
    %c0_4 = arith.constant 0 : index
    %2 = vector.load %arg2[%c0_3, %c0_4] : memref<1x512xf32, #tpu.memory_space<vmem>>, vector<1x512xf32>
    %3 = vector.shape_cast %2 : vector<1x512xf32> to vector<1x512xf32>
    %4 = vector.broadcast %3 : vector<1x512xf32> to vector<2x512xf32>
    %c0_5 = arith.constant 0 : index
    %c0_6 = arith.constant 0 : index
    %5 = vector.load %arg4[%c0_5, %c0_6] : memref<1x512xf32, #tpu.memory_space<vmem>>, vector<1x512xf32>
    %6 = vector.shape_cast %5 : vector<1x512xf32> to vector<1x512xf32>
    %7 = vector.broadcast %6 : vector<1x512xf32> to vector<2x512xf32>
    %cst = arith.constant 0.000000e+00 : f32
    %8 = vector.broadcast %cst : f32 to vector<2x128xf32>
    %cst_7 = arith.constant 0.000000e+00 : f32
    %9 = vector.broadcast %cst_7 : f32 to vector<2x128xf32>
    %cst_8 = arith.constant 0.000000e+00 : f32
    %10 = vector.broadcast %cst_8 : f32 to vector<2x128xf32>
    %cst_9 = arith.constant 0.000000e+00 : f32
    %11 = vector.broadcast %cst_9 : f32 to vector<2x128xf32>
    %c0_10 = arith.constant 0 : index
    %c0_11 = arith.constant 0 : index
    %c0_12 = arith.constant 0 : index
    %12 = vector.load %arg0[%c0_10, %c0_11, %c0_12] : memref<8x2x128xbf16, #tpu.memory_space<vmem>>, vector<1x2x128xbf16>
    %13 = vector.shape_cast %12 : vector<1x2x128xbf16> to vector<2x128xbf16>
    %14 = arith.truncf %8 : vector<2x128xf32> to vector<2x128xbf16>
    %15 = tpu.concatenate %13, %14 in 1 : vector<2x128xbf16>, vector<2x128xbf16> -> vector<2x256xbf16>
    %cst_13 = arith.constant dense<0.000000e+00> : vector<2x512xf32>
    %16 = tpu.matmul %15, %0, %cst_13 {dimension_numbers = #tpu.dot_dimension_numbers<[1], [0], [0], [1], [0, 0, 1, 1], [], []>} : vector<2x256xbf16>, vector<256x512xbf16>, vector<2x512xf32> -> vector<2x512xf32>
    %17 = arith.addf %16, %4 : vector<2x512xf32>
    %18 = vector.extract_strided_slice %17 {offsets = [0, 0], sizes = [2, 128], strides = [1, 1]} : vector<2x512xf32> to vector<2x128xf32>
    %19 = arith.negf %18 : vector<2x128xf32>
    %20 = math.exp %19 : vector<2x128xf32>
    %cst_14 = arith.constant 1.000000e+00 : f32
    %21 = vector.broadcast %cst_14 : f32 to vector<2x128xf32>
    %22 = arith.addf %21, %20 : vector<2x128xf32>
    %23 = arith.divf %21, %22 : vector<2x128xf32>
    %24 = vector.extract_strided_slice %17 {offsets = [0, 128], sizes = [2, 128], strides = [1, 1]} : vector<2x512xf32> to vector<2x128xf32>
    %25 = arith.negf %24 : vector<2x128xf32>
    %26 = math.exp %25 : vector<2x128xf32>
    %cst_15 = arith.constant 1.000000e+00 : f32
    %27 = vector.broadcast %cst_15 : f32 to vector<2x128xf32>
    %28 = arith.addf %27, %26 : vector<2x128xf32>
    %29 = arith.divf %27, %28 : vector<2x128xf32>
    %30 = vector.extract_strided_slice %17 {offsets = [0, 256], sizes = [2, 128], strides = [1, 1]} : vector<2x512xf32> to vector<2x128xf32>
    %31 = math.tanh %30 : vector<2x128xf32>
    %32 = vector.extract_strided_slice %17 {offsets = [0, 384], sizes = [2, 128], strides = [1, 1]} : vector<2x512xf32> to vector<2x128xf32>
    %33 = arith.negf %32 : vector<2x128xf32>
    %34 = math.exp %33 : vector<2x128xf32>
    %cst_16 = arith.constant 1.000000e+00 : f32
    %35 = vector.broadcast %cst_16 : f32 to vector<2x128xf32>
    %36 = arith.addf %35, %34 : vector<2x128xf32>
    %37 = arith.divf %35, %36 : vector<2x128xf32>
    %38 = arith.mulf %29, %9 : vector<2x128xf32>
    %39 = arith.mulf %23, %31 : vector<2x128xf32>
    %40 = arith.addf %38, %39 : vector<2x128xf32>
    %41 = math.tanh %40 : vector<2x128xf32>
    %42 = arith.mulf %37, %41 : vector<2x128xf32>
    %c0_i32 = arith.constant 0 : i32
    %c7_i32 = arith.constant 7 : i32
    %43 = arith.addi %c0_i32, %c7_i32 : i32
    %c1_i32 = arith.constant 1 : i32
    %44:4 = scf.for %arg6 = %c0_i32 to %43 step %c1_i32 iter_args(%arg7 = %42, %arg8 = %40, %arg9 = %10, %arg10 = %11) -> (vector<2x128xf32>, vector<2x128xf32>, vector<2x128xf32>, vector<2x128xf32>)  : i32 {
      %c1_i32_24 = arith.constant 1 : i32
      %78 = arith.addi %arg6, %c1_i32_24 : i32
      %79 = arith.index_cast %78 : i32 to index
      %c0_25 = arith.constant 0 : index
      %c0_26 = arith.constant 0 : index
      %80 = vector.load %arg0[%79, %c0_25, %c0_26] : memref<8x2x128xbf16, #tpu.memory_space<vmem>>, vector<1x2x128xbf16>
      %81 = vector.shape_cast %80 : vector<1x2x128xbf16> to vector<2x128xbf16>
      %82 = arith.truncf %arg7 : vector<2x128xf32> to vector<2x128xbf16>
      %83 = tpu.concatenate %81, %82 in 1 : vector<2x128xbf16>, vector<2x128xbf16> -> vector<2x256xbf16>
      %cst_27 = arith.constant dense<0.000000e+00> : vector<2x512xf32>
      %84 = tpu.matmul %83, %0, %cst_27 {dimension_numbers = #tpu.dot_dimension_numbers<[1], [0], [0], [1], [0, 0, 1, 1], [], []>} : vector<2x256xbf16>, vector<256x512xbf16>, vector<2x512xf32> -> vector<2x512xf32>
      %85 = arith.addf %84, %4 : vector<2x512xf32>
      %86 = vector.extract_strided_slice %85 {offsets = [0, 0], sizes = [2, 128], strides = [1, 1]} : vector<2x512xf32> to vector<2x128xf32>
      %87 = arith.negf %86 : vector<2x128xf32>
      %88 = math.exp %87 : vector<2x128xf32>
      %cst_28 = arith.constant 1.000000e+00 : f32
      %89 = vector.broadcast %cst_28 : f32 to vector<2x128xf32>
      %90 = arith.addf %89, %88 : vector<2x128xf32>
      %91 = arith.divf %89, %90 : vector<2x128xf32>
      %92 = vector.extract_strided_slice %85 {offsets = [0, 128], sizes = [2, 128], strides = [1, 1]} : vector<2x512xf32> to vector<2x128xf32>
      %93 = arith.negf %92 : vector<2x128xf32>
      %94 = math.exp %93 : vector<2x128xf32>
      %cst_29 = arith.constant 1.000000e+00 : f32
      %95 = vector.broadcast %cst_29 : f32 to vector<2x128xf32>
      %96 = arith.addf %95, %94 : vector<2x128xf32>
      %97 = arith.divf %95, %96 : vector<2x128xf32>
      %98 = vector.extract_strided_slice %85 {offsets = [0, 256], sizes = [2, 128], strides = [1, 1]} : vector<2x512xf32> to vector<2x128xf32>
      %99 = math.tanh %98 : vector<2x128xf32>
      %100 = vector.extract_strided_slice %85 {offsets = [0, 384], sizes = [2, 128], strides = [1, 1]} : vector<2x512xf32> to vector<2x128xf32>
      %101 = arith.negf %100 : vector<2x128xf32>
      %102 = math.exp %101 : vector<2x128xf32>
      %cst_30 = arith.constant 1.000000e+00 : f32
      %103 = vector.broadcast %cst_30 : f32 to vector<2x128xf32>
      %104 = arith.addf %103, %102 : vector<2x128xf32>
      %105 = arith.divf %103, %104 : vector<2x128xf32>
      %106 = arith.mulf %97, %arg8 : vector<2x128xf32>
      %107 = arith.mulf %91, %99 : vector<2x128xf32>
      %108 = arith.addf %106, %107 : vector<2x128xf32>
      %109 = math.tanh %108 : vector<2x128xf32>
      %110 = arith.mulf %105, %109 : vector<2x128xf32>
      %111 = arith.truncf %arg7 : vector<2x128xf32> to vector<2x128xbf16>
      %112 = arith.truncf %arg9 : vector<2x128xf32> to vector<2x128xbf16>
      %113 = tpu.concatenate %111, %112 in 1 : vector<2x128xbf16>, vector<2x128xbf16> -> vector<2x256xbf16>
      %cst_31 = arith.constant dense<0.000000e+00> : vector<2x512xf32>
      %114 = tpu.matmul %113, %1, %cst_31 {dimension_numbers = #tpu.dot_dimension_numbers<[1], [0], [0], [1], [0, 0, 1, 1], [], []>} : vector<2x256xbf16>, vector<256x512xbf16>, vector<2x512xf32> -> vector<2x512xf32>
      %115 = arith.addf %114, %7 : vector<2x512xf32>
      %116 = vector.extract_strided_slice %115 {offsets = [0, 0], sizes = [2, 128], strides = [1, 1]} : vector<2x512xf32> to vector<2x128xf32>
      %117 = arith.negf %116 : vector<2x128xf32>
      %118 = math.exp %117 : vector<2x128xf32>
      %cst_32 = arith.constant 1.000000e+00 : f32
      %119 = vector.broadcast %cst_32 : f32 to vector<2x128xf32>
      %120 = arith.addf %119, %118 : vector<2x128xf32>
      %121 = arith.divf %119, %120 : vector<2x128xf32>
      %122 = vector.extract_strided_slice %115 {offsets = [0, 128], sizes = [2, 128], strides = [1, 1]} : vector<2x512xf32> to vector<2x128xf32>
      %123 = arith.negf %122 : vector<2x128xf32>
      %124 = math.exp %123 : vector<2x128xf32>
      %cst_33 = arith.constant 1.000000e+00 : f32
      %125 = vector.broadcast %cst_33 : f32 to vector<2x128xf32>
      %126 = arith.addf %125, %124 : vector<2x128xf32>
      %127 = arith.divf %125, %126 : vector<2x128xf32>
      %128 = vector.extract_strided_slice %115 {offsets = [0, 256], sizes = [2, 128], strides = [1, 1]} : vector<2x512xf32> to vector<2x128xf32>
      %129 = math.tanh %128 : vector<2x128xf32>
      %130 = vector.extract_strided_slice %115 {offsets = [0, 384], sizes = [2, 128], strides = [1, 1]} : vector<2x512xf32> to vector<2x128xf32>
      %131 = arith.negf %130 : vector<2x128xf32>
      %132 = math.exp %131 : vector<2x128xf32>
      %cst_34 = arith.constant 1.000000e+00 : f32
      %133 = vector.broadcast %cst_34 : f32 to vector<2x128xf32>
      %134 = arith.addf %133, %132 : vector<2x128xf32>
      %135 = arith.divf %133, %134 : vector<2x128xf32>
      %136 = arith.mulf %127, %arg10 : vector<2x128xf32>
      %137 = arith.mulf %121, %129 : vector<2x128xf32>
      %138 = arith.addf %136, %137 : vector<2x128xf32>
      %139 = math.tanh %138 : vector<2x128xf32>
      %140 = arith.mulf %135, %139 : vector<2x128xf32>
      %c4_i32 = arith.constant 4 : i32
      %141 = arith.cmpi sge, %arg6, %c4_i32 : i32
      %142 = arith.extui %141 : i1 to i32
      %c0_i32_35 = arith.constant 0 : i32
      %143 = arith.cmpi ne, %142, %c0_i32_35 : i32
      scf.if %143 {
        %c4_i32_36 = arith.constant 4 : i32
        %144 = arith.subi %arg6, %c4_i32_36 : i32
        %145 = arith.index_cast %144 : i32 to index
        %c0_37 = arith.constant 0 : index
        %c0_38 = arith.constant 0 : index
        %146 = vector.load %arg5[%145, %c0_37, %c0_38] : memref<4x2x128xf32, #tpu.memory_space<vmem>>, vector<1x2x128xf32>
        %147 = vector.shape_cast %146 : vector<1x2x128xf32> to vector<2x128xf32>
        %148 = vector.shape_cast %140 : vector<2x128xf32> to vector<1x2x128xf32>
        tpu.vector_store %arg5[%145, %c0_37, %c0_38], %148 {strides = array<i32>} : memref<4x2x128xf32, #tpu.memory_space<vmem>>, vector<1x2x128xf32>,
      } else {
      }
      scf.yield %110, %108, %140, %138 : vector<2x128xf32>, vector<2x128xf32>, vector<2x128xf32>, vector<2x128xf32>
    }
    %c7_i32_17 = arith.constant 7 : i32
    %45 = arith.truncf %44#0 : vector<2x128xf32> to vector<2x128xbf16>
    %46 = arith.truncf %44#2 : vector<2x128xf32> to vector<2x128xbf16>
    %47 = tpu.concatenate %45, %46 in 1 : vector<2x128xbf16>, vector<2x128xbf16> -> vector<2x256xbf16>
    %cst_18 = arith.constant dense<0.000000e+00> : vector<2x512xf32>
    %48 = tpu.matmul %47, %1, %cst_18 {dimension_numbers = #tpu.dot_dimension_numbers<[1], [0], [0], [1], [0, 0, 1, 1], [], []>} : vector<2x256xbf16>, vector<256x512xbf16>, vector<2x512xf32> -> vector<2x512xf32>
    %49 = arith.addf %48, %7 : vector<2x512xf32>
    %50 = vector.extract_strided_slice %49 {offsets = [0, 0], sizes = [2, 128], strides = [1, 1]} : vector<2x512xf32> to vector<2x128xf32>
    %51 = arith.negf %50 : vector<2x128xf32>
    %52 = math.exp %51 : vector<2x128xf32>
    %cst_19 = arith.constant 1.000000e+00 : f32
    %53 = vector.broadcast %cst_19 : f32 to vector<2x128xf32>
    %54 = arith.addf %53, %52 : vector<2x128xf32>
    %55 = arith.divf %53, %54 : vector<2x128xf32>
    %56 = vector.extract_strided_slice %49 {offsets = [0, 128], sizes = [2, 128], strides = [1, 1]} : vector<2x512xf32> to vector<2x128xf32>
    %57 = arith.negf %56 : vector<2x128xf32>
    %58 = math.exp %57 : vector<2x128xf32>
    %cst_20 = arith.constant 1.000000e+00 : f32
    %59 = vector.broadcast %cst_20 : f32 to vector<2x128xf32>
    %60 = arith.addf %59, %58 : vector<2x128xf32>
    %61 = arith.divf %59, %60 : vector<2x128xf32>
    %62 = vector.extract_strided_slice %49 {offsets = [0, 256], sizes = [2, 128], strides = [1, 1]} : vector<2x512xf32> to vector<2x128xf32>
    %63 = math.tanh %62 : vector<2x128xf32>
    %64 = vector.extract_strided_slice %49 {offsets = [0, 384], sizes = [2, 128], strides = [1, 1]} : vector<2x512xf32> to vector<2x128xf32>
    %65 = arith.negf %64 : vector<2x128xf32>
    %66 = math.exp %65 : vector<2x128xf32>
    %cst_21 = arith.constant 1.000000e+00 : f32
    %67 = vector.broadcast %cst_21 : f32 to vector<2x128xf32>
    %68 = arith.addf %67, %66 : vector<2x128xf32>
    %69 = arith.divf %67, %68 : vector<2x128xf32>
    %70 = arith.mulf %61, %44#3 : vector<2x128xf32>
    %71 = arith.mulf %55, %63 : vector<2x128xf32>
    %72 = arith.addf %70, %71 : vector<2x128xf32>
    %73 = math.tanh %72 : vector<2x128xf32>
    %74 = arith.mulf %69, %73 : vector<2x128xf32>
    %c3 = arith.constant 3 : index
    %c0_22 = arith.constant 0 : index
    %c0_23 = arith.constant 0 : index
    %75 = vector.load %arg5[%c3, %c0_22, %c0_23] : memref<4x2x128xf32, #tpu.memory_space<vmem>>, vector<1x2x128xf32>
    %76 = vector.shape_cast %75 : vector<1x2x128xf32> to vector<2x128xf32>
    %77 = vector.shape_cast %74 : vector<2x128xf32> to vector<1x2x128xf32>
    tpu.vector_store %arg5[%c3, %c0_22, %c0_23], %77 {strides = array<i32>} : memref<4x2x128xf32, #tpu.memory_space<vmem>>, vector<1x2x128xf32>,
    return
  }
}

</mosaic_0001>

<bundles_post_ra>
// kernel: tpu_custom_call.1
= control target key start
LH: loop header
LB: loop body
LE: loop exit
PB: predicated region body
PF: predicated region fallthrough
CT: control target
= control target key end

     0   :  { %10 = vsyncpa [#allocation3], 0  ;;  %s3203_s0 = inlined_call_operand.hbm [shape: bf16[8,2,128], index: 0, kind: input, shape index: {}]   ;;  %s3204_s1 = inlined_call_operand.hbm [shape: bf16[256,512], index: 1, kind: input, shape index: {}]   ;;  %s3205_s2 = inlined_call_operand.vmem [shape: f32[1,512], index: 2, kind: input, shape index: {}]   ;;  %s3206_s3 = inlined_call_operand.hbm [shape: bf16[256,512], index: 3, kind: input, shape index: {}]   ;;  %s3207_s4 = inlined_call_operand.vmem [shape: f32[1,512], index: 4, kind: input, shape index: {}]   ;;  %s3208_s5 = inlined_call_operand.hbm [shape: f32[4,2,128], index: 5, kind: output, shape index: {}]  }
   0x1   :  { %11 = vsyncpa [#allocation6], 0 }
   0x2   :  { %12 = vsyncpa [#allocation4], 0  ;;  %s2238_s18 = smov [#allocation5]   ;;  %s2104_s22 = scalar_lea.hbm %s3204_s1, 8192 }
   0x3   :  { %s30_s19 = sshll.u32 %s2238_s18, 4  ;;  %p2105_p0 = scmp.ne.s32.totalorder %s3204_s1, %s2104_s22  ;;  %s31_s19 = int_to_ptr.vmem [resolvable:$true] %s30_s19 }
   0x4   :  { %p2108_p1 = scmp.lt.u32.totalorder %s2104_s22, %s3204_s1 }
   0x6   :  { %p2110_p2 = pnand %p2108_p1, %p2105_p0 }
   0x8   :  { %2113 = shalt.err (!%p2110_p2)
}
   0x9   :  { %s2114_s27 = scalar_lea.vmem %s31_s19, 8192  ;;  %p2119_p4 = scmp.lt.s32.totalorder %s31_s19, %s31_s19 }
   0xa   :  { %p2115_p3 = scmp.ne.s32.totalorder %s31_s19, %s2114_s27  ;;  %p2120_p5 = scmp.lt.s32.totalorder %s2114_s27, %s2114_s27 }
   0xc   :  { %p2121_p6 = por %p2120_p5, %p2119_p4 }
   0xe   :  { %p2122_p7 = pnand %p2121_p6, %p2115_p3 }
  0x10   :  { %2125 = shalt.err (!%p2122_p7)
}
  0x11   :  { %s2239_s28 = smov 256   ;;  %s2240_s29 = smov 16  }
  0x12   :  { %36 = dma.hbm_to_vmem [thread:$0]  %s3204_s1, 8192, %s31_s19, [#allocation6], %s2239_s28, %s2239_s28, %s2240_s29  }
  0x13   :  { %s2241_s7 = smov [#allocation2]   ;;  %s2126_s11 = scalar_lea.hbm %s3203_s0, 128 }
  0x14   :  { %s18_s8 = sshll.u32 %s2241_s7, 4  ;;  %p2127_p8 = scmp.ne.s32.totalorder %s3203_s0, %s2126_s11  ;;  %s19_s8 = int_to_ptr.vmem [resolvable:$true] %s18_s8 }
  0x15   :  { %p2130_p9 = scmp.lt.u32.totalorder %s2126_s11, %s3203_s0 }
  0x17   :  { %p2132_p10 = pnand %p2130_p9, %p2127_p8 }
  0x19   :  { %2135 = shalt.err (!%p2132_p10)
}
  0x1a   :  { %s2136_s16 = scalar_lea.vmem %s19_s8, 128  ;;  %p2141_p12 = scmp.lt.s32.totalorder %s19_s8, %s19_s8 }
  0x1b   :  { %p2137_p11 = scmp.ne.s32.totalorder %s19_s8, %s2136_s16  ;;  %p2142_p13 = scmp.lt.s32.totalorder %s2136_s16, %s2136_s16 }
  0x1d   :  { %p2143_p0 = por %p2142_p13, %p2141_p12 }
  0x1f   :  { %p2144_p1 = pnand %p2143_p0, %p2137_p11 }
  0x21   :  { %2147 = shalt.err (!%p2144_p1)
}
  0x22   :  { %s2242_s1 = smov 1   ;;  %s2243_s19 = smov [#allocation7]  }
  0x23   :  { %24 = dma.hbm_to_vmem [thread:$0]  %s3203_s0, 128, %s19_s8, [#allocation3], %s2240_s29, %s2240_s29, %s2242_s1  }
  0x24   :  { %s44_s20 = sshll.u32 %s2243_s19, 4  ;;  %s2148_s23 = scalar_lea.hbm %s3206_s3, 8192  ;;  %s45_s20 = int_to_ptr.vmem [resolvable:$true] %s44_s20 }
  0x25   :  { %p2149_p2 = scmp.ne.s32.totalorder %s3206_s3, %s2148_s23  ;;  %p2152_p3 = scmp.lt.u32.totalorder %s2148_s23, %s3206_s3 }
  0x27   :  { %p2154_p4 = pnand %p2152_p3, %p2149_p2 }
  0x29   :  { %2157 = shalt.err (!%p2154_p4)
}
  0x2a   :  { %s2158_s30 = scalar_lea.vmem %s45_s20, 8192  ;;  %p2163_p6 = scmp.lt.s32.totalorder %s45_s20, %s45_s20 }
  0x2b   :  { %p2159_p5 = scmp.ne.s32.totalorder %s45_s20, %s2158_s30  ;;  %p2164_p7 = scmp.lt.s32.totalorder %s2158_s30, %s2158_s30 }
  0x2d   :  { %p2165_p8 = por %p2164_p7, %p2163_p6 }
  0x2f   :  { %p2166_p9 = pnand %p2165_p8, %p2159_p5 }
  0x31   :  { %2169 = shalt.err (!%p2166_p9)
}
  0x32   :  { %50 = dma.hbm_to_vmem [thread:$0]  %s3206_s3, 8192, %s45_s20, [#allocation6], %s2239_s28, %s2239_s28, %s2240_s29  }
  0x33   :  { %2212 = dma.done.wait [#allocation3], 128  }
  0x34   :  { %2213 = vsyncadd [#allocation3], 4294967168 }
  0x35   :  { %2214 = dma.done.wait [#allocation6], 16384  }
  0x36   :  { %2215 = vsyncadd [#allocation6], 4294950912  ;;  %v2244_v0 = vmov 0   ;;  %v2322_v1 = vld [vmem:[#allocation7] sm:$0xff]  ;;  %v2324_v2 = vld [vmem:[#allocation7 + $0x8] sm:$0xff] }
  0x37   :  { %588 = vmatprep.mubr.bf16.mxu0 %v2244_v0  ;;  %629 = vmatprep.mubr.bf16.mxu1 %v2244_v0  ;;  %3429 = vst [vmem:[#allocation12_spill] sm:$0xff] %v2322_v1  ;;  %3430 = vst [vmem:[#allocation13_spill] sm:$0xff] %v2324_v2  ;;  %v2326_v3 = vld [vmem:[#allocation7 + $0x10] sm:$0xff]  ;;  %v2328_v4 = vld [vmem:[#allocation7 + $0x18] sm:$0xff] }
  0x38   :  { %3431 = vst [vmem:[#allocation14_spill] sm:$0xff] %v2326_v3  ;;  %3432 = vst [vmem:[#allocation15_spill] sm:$0xff] %v2328_v4  ;;  %v2330_v5 = vld [vmem:[#allocation7 + $0x20] sm:$0xff]  ;;  %v2332_v6 = vld [vmem:[#allocation7 + $0x28] sm:$0xff] }
  0x39   :  { %3433 = vst [vmem:[#allocation16_spill] sm:$0xff] %v2330_v5  ;;  %3434 = vst [vmem:[#allocation17_spill] sm:$0xff] %v2332_v6  ;;  %v2334_v7 = vld [vmem:[#allocation7 + $0x30] sm:$0xff]  ;;  %v2336_v8 = vld [vmem:[#allocation7 + $0x38] sm:$0xff] }
  0x3a   :  { %3435 = vst [vmem:[#allocation18_spill] sm:$0xff] %v2334_v7  ;;  %3436 = vst [vmem:[#allocation19_spill] sm:$0xff] %v2336_v8  ;;  %v2338_v9 = vld [vmem:[#allocation7 + $0x40] sm:$0xff]  ;;  %v2340_v10 = vld [vmem:[#allocation7 + $0x48] sm:$0xff] }
  0x3b   :  { %3437 = vst [vmem:[#allocation20_spill] sm:$0xff] %v2338_v9  ;;  %3438 = vst [vmem:[#allocation21_spill] sm:$0xff] %v2340_v10  ;;  %v2342_v11 = vld [vmem:[#allocation7 + $0x50] sm:$0xff]  ;;  %v2344_v12 = vld [vmem:[#allocation7 + $0x58] sm:$0xff] }
  0x3c   :  { %3439 = vst [vmem:[#allocation22_spill] sm:$0xff] %v2342_v11  ;;  %3440 = vst [vmem:[#allocation23_spill] sm:$0xff] %v2344_v12  ;;  %v2346_v13 = vld [vmem:[#allocation7 + $0x60] sm:$0xff]  ;;  %v2348_v14 = vld [vmem:[#allocation7 + $0x68] sm:$0xff] }
  0x3d   :  { %3441 = vst [vmem:[#allocation24_spill] sm:$0xff] %v2346_v13  ;;  %3442 = vst [vmem:[#allocation25_spill] sm:$0xff] %v2348_v14  ;;  %v2350_v15 = vld [vmem:[#allocation7 + $0x70] sm:$0xff]  ;;  %v2352_v16 = vld [vmem:[#allocation7 + $0x78] sm:$0xff] }
  0x3e   :  { %3443 = vst [vmem:[#allocation26_spill] sm:$0xff] %v2350_v15  ;;  %3444 = vst [vmem:[#allocation27_spill] sm:$0xff] %v2352_v16  ;;  %v2354_v17 = vld [vmem:[#allocation7 + $0x80] sm:$0xff]  ;;  %v2356_v18 = vld [vmem:[#allocation7 + $0x88] sm:$0xff] }
  0x3f   :  { %3445 = vst [vmem:[#allocation28_spill] sm:$0xff] %v2354_v17  ;;  %3446 = vst [vmem:[#allocation29_spill] sm:$0xff] %v2356_v18  ;;  %v2358_v19 = vld [vmem:[#allocation7 + $0x90] sm:$0xff]  ;;  %v2360_v20 = vld [vmem:[#allocation7 + $0x98] sm:$0xff] }
  0x40   :  { %3447 = vst [vmem:[#allocation30_spill] sm:$0xff] %v2358_v19  ;;  %3448 = vst [vmem:[#allocation31_spill] sm:$0xff] %v2360_v20  ;;  %v2362_v21 = vld [vmem:[#allocation7 + $0xa0] sm:$0xff]  ;;  %v2364_v22 = vld [vmem:[#allocation7 + $0xa8] sm:$0xff] }
  0x41   :  { %3449 = vst [vmem:[#allocation32_spill] sm:$0xff] %v2362_v21  ;;  %3450 = vst [vmem:[#allocation33_spill] sm:$0xff] %v2364_v22  ;;  %v2366_v23 = vld [vmem:[#allocation7 + $0xb0] sm:$0xff]  ;;  %v2368_v24 = vld [vmem:[#allocation7 + $0xb8] sm:$0xff] }
  0x42   :  { %3451 = vst [vmem:[#allocation34_spill] sm:$0xff] %v2366_v23  ;;  %3452 = vst [vmem:[#allocation35_spill] sm:$0xff] %v2368_v24  ;;  %v2370_v25 = vld [vmem:[#allocation7 + $0xc0] sm:$0xff]  ;;  %v2372_v26 = vld [vmem:[#allocation7 + $0xc8] sm:$0xff] }
  0x43   :  { %3453 = vst [vmem:[#allocation36_spill] sm:$0xff] %v2370_v25  ;;  %3454 = vst [vmem:[#allocation37_spill] sm:$0xff] %v2372_v26  ;;  %v2374_v27 = vld [vmem:[#allocation7 + $0xd0] sm:$0xff]  ;;  %v2376_v28 = vld [vmem:[#allocation7 + $0xd8] sm:$0xff]  ;;  %v193_v26 = vlaneseq }
  0x44   :  { %3455 = vst [vmem:[#allocation38_spill] sm:$0xff] %v2374_v27  ;;  %3456 = vst [vmem:[#allocation39_spill] sm:$0xff] %v2376_v28  ;;  %v2378_v29 = vld [vmem:[#allocation7 + $0xe0] sm:$0xff]  ;;  %v2380_v30 = vld [vmem:[#allocation7 + $0xe8] sm:$0xff] }
  0x45   :  { %3457 = vst [vmem:[#allocation40_spill] sm:$0xff] %v2378_v29  ;;  %3458 = vst [vmem:[#allocation41_spill] sm:$0xff] %v2380_v30  ;;  %v2382_v31 = vld [vmem:[#allocation7 + $0xf0] sm:$0xff]  ;;  %v2384_v32 = vld [vmem:[#allocation7 + $0xf8] sm:$0xff]  ;;  %v2566_v24 = vshrl.u32 %v193_v26, 7 }
  0x46   :  { %3459 = vst [vmem:[#allocation42_spill] sm:$0xff] %v2382_v31  ;;  %3460 = vst [vmem:[#allocation43_spill] sm:$0xff] %v2384_v32  ;;  %v2386_v33 = vld [vmem:[#allocation7 + $0x100] sm:$0xff]  ;;  %v2388_v34 = vld [vmem:[#allocation7 + $0x108] sm:$0xff] }
  0x47   :  { %3461 = vst [vmem:[#allocation44_spill] sm:$0xff] %v2386_v33  ;;  %3462 = vst [vmem:[#allocation45_spill] sm:$0xff] %v2388_v34  ;;  %v2390_v35 = vld [vmem:[#allocation7 + $0x110] sm:$0xff]  ;;  %v2392_v36 = vld [vmem:[#allocation7 + $0x118] sm:$0xff]  ;;  %v195_v17 = vsub.s32 0, %v2566_v24 }
  0x48   :  { %3463 = vst [vmem:[#allocation46_spill] sm:$0xff] %v2390_v35  ;;  %3464 = vst [vmem:[#allocation47_spill] sm:$0xff] %v2392_v36  ;;  %v2394_v37 = vld [vmem:[#allocation7 + $0x120] sm:$0xff]  ;;  %v2396_v38 = vld [vmem:[#allocation7 + $0x128] sm:$0xff] }
  0x49   :  { %3465 = vst [vmem:[#allocation48_spill] sm:$0xff] %v2394_v37  ;;  %3466 = vst [vmem:[#allocation49_spill] sm:$0xff] %v2396_v38  ;;  %v2398_v39 = vld [vmem:[#allocation7 + $0x130] sm:$0xff]  ;;  %v2400_v40 = vld [vmem:[#allocation7 + $0x138] sm:$0xff] }
  0x4a   :  { %3467 = vst [vmem:[#allocation50_spill] sm:$0xff] %v2398_v39  ;;  %3468 = vst [vmem:[#allocation51_spill] sm:$0xff] %v2400_v40  ;;  %v2402_v41 = vld [vmem:[#allocation7 + $0x140] sm:$0xff]  ;;  %v2404_v42 = vld [vmem:[#allocation7 + $0x148] sm:$0xff] }
  0x4b   :  { %3469 = vst [vmem:[#allocation52_spill] sm:$0xff] %v2402_v41  ;;  %3470 = vst [vmem:[#allocation53_spill] sm:$0xff] %v2404_v42  ;;  %v2406_v43 = vld [vmem:[#allocation7 + $0x150] sm:$0xff]  ;;  %v2408_v44 = vld [vmem:[#allocation7 + $0x158] sm:$0xff] }
  0x4c   :  { %3471 = vst [vmem:[#allocation54_spill] sm:$0xff] %v2406_v43  ;;  %3472 = vst [vmem:[#allocation55_spill] sm:$0xff] %v2408_v44  ;;  %v2410_v45 = vld [vmem:[#allocation7 + $0x160] sm:$0xff]  ;;  %v2412_v46 = vld [vmem:[#allocation7 + $0x168] sm:$0xff] }
  0x4d   :  { %3473 = vst [vmem:[#allocation56_spill] sm:$0xff] %v2410_v45  ;;  %3474 = vst [vmem:[#allocation57_spill] sm:$0xff] %v2412_v46  ;;  %v2414_v47 = vld [vmem:[#allocation7 + $0x170] sm:$0xff]  ;;  %v2416_v48 = vld [vmem:[#allocation7 + $0x178] sm:$0xff] }
  0x4e   :  { %3475 = vst [vmem:[#allocation58_spill] sm:$0xff] %v2414_v47  ;;  %3476 = vst [vmem:[#allocation59_spill] sm:$0xff] %v2416_v48  ;;  %v2418_v49 = vld [vmem:[#allocation7 + $0x180] sm:$0xff]  ;;  %v2420_v50 = vld [vmem:[#allocation7 + $0x188] sm:$0xff] }
  0x4f   :  { %3477 = vst [vmem:[#allocation60_spill] sm:$0xff] %v2418_v49  ;;  %3478 = vst [vmem:[#allocation61_spill] sm:$0xff] %v2420_v50  ;;  %v2422_v51 = vld [vmem:[#allocation7 + $0x190] sm:$0xff]  ;;  %v2424_v52 = vld [vmem:[#allocation7 + $0x198] sm:$0xff] }
  0x50   :  { %3479 = vst [vmem:[#allocation62_spill] sm:$0xff] %v2422_v51  ;;  %3480 = vst [vmem:[#allocation63_spill] sm:$0xff] %v2424_v52  ;;  %v2426_v53 = vld [vmem:[#allocation7 + $0x1a0] sm:$0xff]  ;;  %v2428_v54 = vld [vmem:[#allocation7 + $0x1a8] sm:$0xff] }
  0x51   :  { %3481 = vst [vmem:[#allocation64_spill] sm:$0xff] %v2426_v53  ;;  %3482 = vst [vmem:[#allocation65_spill] sm:$0xff] %v2428_v54  ;;  %v2430_v55 = vld [vmem:[#allocation7 + $0x1b0] sm:$0xff]  ;;  %v2432_v56 = vld [vmem:[#allocation7 + $0x1b8] sm:$0xff] }
  0x52   :  { %3483 = vst [vmem:[#allocation66_spill] sm:$0xff] %v2430_v55  ;;  %3484 = vst [vmem:[#allocation67_spill] sm:$0xff] %v2432_v56  ;;  %v2434_v57 = vld [vmem:[#allocation7 + $0x1c0] sm:$0xff]  ;;  %v2436_v58 = vld [vmem:[#allocation7 + $0x1c8] sm:$0xff] }
  0x53   :  { %3485 = vst [vmem:[#allocation68_spill] sm:$0xff] %v2434_v57  ;;  %3486 = vst [vmem:[#allocation69_spill] sm:$0xff] %v2436_v58  ;;  %v2438_v59 = vld [vmem:[#allocation7 + $0x1d0] sm:$0xff]  ;;  %v2440_v60 = vld [vmem:[#allocation7 + $0x1d8] sm:$0xff] }
  0x54   :  { %3487 = vst [vmem:[#allocation70_spill] sm:$0xff] %v2438_v59  ;;  %3488 = vst [vmem:[#allocation71_spill] sm:$0xff] %v2440_v60  ;;  %v2442_v61 = vld [vmem:[#allocation7 + $0x1e0] sm:$0xff]  ;;  %v2444_v62 = vld [vmem:[#allocation7 + $0x1e8] sm:$0xff] }
  0x55   :  { %3489 = vst [vmem:[#allocation72_spill] sm:$0xff] %v2442_v61  ;;  %3490 = vst [vmem:[#allocation73_spill] sm:$0xff] %v2444_v62  ;;  %v2446_v63 = vld [vmem:[#allocation7 + $0x1f0] sm:$0xff]  ;;  %v2448_v0 = vld [vmem:[#allocation7 + $0x1f8] sm:$0xff] }
  0x56   :  { %3491 = vst [vmem:[#allocation74_spill] sm:$0xff] %v2446_v63  ;;  %3492 = vst [vmem:[#allocation75_spill] sm:$0xff] %v2448_v0  ;;  %v2450_v54 = vld [vmem:[#allocation5 + $0x4] ss:$16 sps:$4 sm:$0xff]   ;;  %v2452_v53 = vld [vmem:[#allocation5] ss:$16 sps:$4 sm:$0xff]  }
  0x57   :  { %3493 = vst [vmem:[#allocation76_spill] sm:$0xff] %v2450_v54  ;;  %3494 = vst [vmem:[#allocation77_spill] sm:$0xff] %v2452_v53  ;;  %v2454_v56 = vld [vmem:[#allocation5 + $0x24] ss:$16 sps:$4 sm:$0xff]   ;;  %556 = vmatprep.subr.bf16.mxu0 %v2450_v54  ;;  %v2458_v58 = vld [vmem:[#allocation5 + $0x20] ss:$16 sps:$4 sm:$0xff]  }
  0x58   :  { %3495 = vst [vmem:[#allocation78_spill] sm:$0xff] %v2454_v56  ;;  %557 = vmatpush1.bf16.msra.mxu0 %v2452_v53  ;;  %3496 = vst [vmem:[#allocation79_spill] sm:$0xff] %v2458_v58  ;;  %v2461_v61 = vld [vmem:[#allocation5 + $0x44] ss:$16 sps:$4 sm:$0xff]   ;;  %v2463_v62 = vld [vmem:[#allocation5 + $0xc] ss:$16 sps:$4 sm:$0xff]  }
  0x59   :  { %558 = vmatprep.subr.bf16.mxu0 %v2454_v56  ;;  %3497 = vst [vmem:[#allocation80_spill] sm:$0xff] %v2461_v61  ;;  %3498 = vst [vmem:[#allocation81_spill] sm:$0xff] %v2463_v62  ;;  %v2465_v63 = vld [vmem:[#allocation5 + $0x8] ss:$16 sps:$4 sm:$0xff]   ;;  %v2467_v0 = vld [vmem:[#allocation5 + $0x40] ss:$16 sps:$4 sm:$0xff]   ;;  %597 = vmatprep.subr.bf16.mxu1 %v2463_v62 }
  0x5a   :  { %3499 = vst [vmem:[#allocation82_spill] sm:$0xff] %v2465_v63  ;;  %3500 = vst [vmem:[#allocation83_spill] sm:$0xff] %v2467_v0  ;;  %v2471_v60 = vld [vmem:[#allocation5 + $0x2c] ss:$16 sps:$4 sm:$0xff]   ;;  %v2474_v57 = vld [vmem:[#allocation5 + $0x64] ss:$16 sps:$4 sm:$0xff]   ;;  %598 = vmatpush1.bf16.msra.mxu1 %v2465_v63 }
  0x5b   :  { %3501 = vst [vmem:[#allocation84_spill] sm:$0xff] %v2471_v60  ;;  %3502 = vst [vmem:[#allocation85_spill] sm:$0xff] %v2474_v57  ;;  %v2477_v59 = vld [vmem:[#allocation5 + $0x28] ss:$16 sps:$4 sm:$0xff]   ;;  %599 = vmatprep.subr.bf16.mxu1 %v2471_v60  ;;  %v2480_v55 = vld [vmem:[#allocation5 + $0x60] ss:$16 sps:$4 sm:$0xff]  }
  0x5c   :  { %559 = vmatpush1.bf16.msra.mxu0 %v2458_v58  ;;  %3503 = vst [vmem:[#allocation86_spill] sm:$0xff] %v2477_v59  ;;  %3504 = vst [vmem:[#allocation87_spill] sm:$0xff] %v2480_v55  ;;  %v2482_v50 = vld [vmem:[#allocation5 + $0x4c] ss:$16 sps:$4 sm:$0xff]   ;;  %v2485_v52 = vld [vmem:[#allocation5 + $0x84] ss:$16 sps:$4 sm:$0xff]  }
  0x5d   :  { %560 = vmatprep.subr.bf16.mxu0 %v2461_v61  ;;  %3505 = vst [vmem:[#allocation88_spill] sm:$0xff] %v2482_v50  ;;  %3506 = vst [vmem:[#allocation89_spill] sm:$0xff] %v2485_v52  ;;  %v2489_v49 = vld [vmem:[#allocation5 + $0x48] ss:$16 sps:$4 sm:$0xff]   ;;  %v2492_v51 = vld [vmem:[#allocation5 + $0x6c] ss:$16 sps:$4 sm:$0xff]  }
  0x5e   :  { %600 = vmatpush1.bf16.msra.mxu1 %v2477_v59  ;;  %3507 = vst [vmem:[#allocation90_spill] sm:$0xff] %v2489_v49  ;;  %3508 = vst [vmem:[#allocation91_spill] sm:$0xff] %v2492_v51  ;;  %v2495_v46 = vld [vmem:[#allocation5 + $0x80] ss:$16 sps:$4 sm:$0xff]   ;;  %v2498_v48 = vld [vmem:[#allocation5 + $0xa4] ss:$16 sps:$4 sm:$0xff]  }
  0x5f   :  { %601 = vmatprep.subr.bf16.mxu1 %v2482_v50  ;;  %3509 = vst [vmem:[#allocation92_spill] sm:$0xff] %v2495_v46  ;;  %3510 = vst [vmem:[#allocation93_spill] sm:$0xff] %v2498_v48  ;;  %v2501_v45 = vld [vmem:[#allocation5 + $0x68] ss:$16 sps:$4 sm:$0xff]   ;;  %v2504_v47 = vld [vmem:[#allocation5 + $0x8c] ss:$16 sps:$4 sm:$0xff]  }
  0x60   :  { %561 = vmatpush1.bf16.msra.mxu0 %v2467_v0  ;;  %3511 = vst [vmem:[#allocation94_spill] sm:$0xff] %v2501_v45  ;;  %3512 = vst [vmem:[#allocation95_spill] sm:$0xff] %v2504_v47  ;;  %v2506_v42 = vld [vmem:[#allocation5 + $0xa0] ss:$16 sps:$4 sm:$0xff]   ;;  %v2509_v44 = vld [vmem:[#allocation5 + $0xc4] ss:$16 sps:$4 sm:$0xff]  }
  0x61   :  { %562 = vmatprep.subr.bf16.mxu0 %v2474_v57  ;;  %3513 = vst [vmem:[#allocation96_spill] sm:$0xff] %v2506_v42  ;;  %3514 = vst [vmem:[#allocation97_spill] sm:$0xff] %v2509_v44  ;;  %v2513_v41 = vld [vmem:[#allocation5 + $0x88] ss:$16 sps:$4 sm:$0xff]   ;;  %v2516_v43 = vld [vmem:[#allocation5 + $0xac] ss:$16 sps:$4 sm:$0xff]  }
  0x62   :  { %602 = vmatpush1.bf16.msra.mxu1 %v2489_v49  ;;  %3515 = vst [vmem:[#allocation98_spill] sm:$0xff] %v2513_v41  ;;  %3516 = vst [vmem:[#allocation99_spill] sm:$0xff] %v2516_v43  ;;  %v2519_v38 = vld [vmem:[#allocation5 + $0xc0] ss:$16 sps:$4 sm:$0xff]   ;;  %v2522_v40 = vld [vmem:[#allocation5 + $0xe4] ss:$16 sps:$4 sm:$0xff]  }
  0x63   :  { %603 = vmatprep.subr.bf16.mxu1 %v2492_v51  ;;  %3517 = vst [vmem:[#allocation100_spill] sm:$0xff] %v2519_v38  ;;  %3518 = vst [vmem:[#allocation101_spill] sm:$0xff] %v2522_v40  ;;  %v2525_v37 = vld [vmem:[#allocation5 + $0xa8] ss:$16 sps:$4 sm:$0xff]   ;;  %v2528_v39 = vld [vmem:[#allocation5 + $0xcc] ss:$16 sps:$4 sm:$0xff]  }
  0x64   :  { %563 = vmatpush1.bf16.msra.mxu0 %v2480_v55  ;;  %3519 = vst [vmem:[#allocation102_spill] sm:$0xff] %v2525_v37  ;;  %3520 = vst [vmem:[#allocation103_spill] sm:$0xff] %v2528_v39  ;;  %v2530_v34 = vld [vmem:[#allocation5 + $0xe0] ss:$16 sps:$4 sm:$0xff]   ;;  %v2533_v36 = vld [vmem:[#allocation5 + $0x104] ss:$16 sps:$4 sm:$0xff]  }
  0x65   :  { %564 = vmatprep.subr.bf16.mxu0 %v2485_v52  ;;  %3521 = vst [vmem:[#allocation104_spill] sm:$0xff] %v2530_v34  ;;  %3522 = vst [vmem:[#allocation105_spill] sm:$0xff] %v2533_v36  ;;  %v2537_v33 = vld [vmem:[#allocation5 + $0xc8] ss:$16 sps:$4 sm:$0xff]   ;;  %v2540_v35 = vld [vmem:[#allocation5 + $0xec] ss:$16 sps:$4 sm:$0xff]  }
  0x66   :  { %604 = vmatpush1.bf16.msra.mxu1 %v2501_v45  ;;  %3523 = vst [vmem:[#allocation106_spill] sm:$0xff] %v2537_v33  ;;  %3524 = vst [vmem:[#allocation107_spill] sm:$0xff] %v2540_v35  ;;  %v2543_v30 = vld [vmem:[#allocation5 + $0x100] ss:$16 sps:$4 sm:$0xff]   ;;  %v2546_v32 = vld [vmem:[#allocation5 + $0x124] ss:$16 sps:$4 sm:$0xff]  }
  0x67   :  { %605 = vmatprep.subr.bf16.mxu1 %v2504_v47  ;;  %3525 = vst [vmem:[#allocation108_spill] sm:$0xff] %v2543_v30  ;;  %3526 = vst [vmem:[#allocation109_spill] sm:$0xff] %v2546_v32  ;;  %v2549_v29 = vld [vmem:[#allocation5 + $0xe8] ss:$16 sps:$4 sm:$0xff]   ;;  %v2552_v31 = vld [vmem:[#allocation5 + $0x10c] ss:$16 sps:$4 sm:$0xff]  }
  0x68   :  { %565 = vmatpush1.bf16.msra.mxu0 %v2495_v46  ;;  %3527 = vst [vmem:[#allocation110_spill] sm:$0xff] %v2549_v29  ;;  %3528 = vst [vmem:[#allocation111_spill] sm:$0xff] %v2552_v31  ;;  %v2554_v28 = vld [vmem:[#allocation5 + $0x120] ss:$16 sps:$4 sm:$0xff]   ;;  %v2557_v25 = vld [vmem:[#allocation5 + $0x144] ss:$16 sps:$4 sm:$0xff]  }
  0x69   :  { %566 = vmatprep.subr.bf16.mxu0 %v2498_v48  ;;  %3529 = vst [vmem:[#allocation112_spill] sm:$0xff] %v2554_v28  ;;  %3530 = vst [vmem:[#allocation113_spill] sm:$0xff] %v2557_v25  ;;  %v2561_v27 = vld [vmem:[#allocation5 + $0x108] ss:$16 sps:$4 sm:$0xff]   ;;  %v2564_v22 = vld [vmem:[#allocation5 + $0x12c] ss:$16 sps:$4 sm:$0xff]  }
  0x6a   :  { %606 = vmatpush1.bf16.msra.mxu1 %v2513_v41  ;;  %3531 = vst [vmem:[#allocation114_spill] sm:$0xff] %v2561_v27  ;;  %3532 = vst [vmem:[#allocation115_spill] sm:$0xff] %v2564_v22  ;;  %v2569_v21 = vld [vmem:[#allocation5 + $0x140] ss:$16 sps:$4 sm:$0xff]   ;;  %v2572_v23 = vld [vmem:[#allocation5 + $0x164] ss:$16 sps:$4 sm:$0xff]  }
  0x6b   :  { %607 = vmatprep.subr.bf16.mxu1 %v2516_v43  ;;  %3533 = vst [vmem:[#allocation116_spill] sm:$0xff] %v2569_v21  ;;  %3534 = vst [vmem:[#allocation117_spill] sm:$0xff] %v2572_v23  ;;  %v2575_v18 = vld [vmem:[#allocation5 + $0x128] ss:$16 sps:$4 sm:$0xff]   ;;  %v2578_v20 = vld [vmem:[#allocation5 + $0x14c] ss:$16 sps:$4 sm:$0xff]  }
  0x6c   :  { %567 = vmatpush1.bf16.msra.mxu0 %v2506_v42  ;;  %3535 = vst [vmem:[#allocation118_spill] sm:$0xff] %v2575_v18  ;;  %3536 = vst [vmem:[#allocation119_spill] sm:$0xff] %v2578_v20  ;;  %v213_v26 = vld [vmem:[%s3207_s4] sm:$0xf]  ;;  %v2585_v19 = vld [vmem:[#allocation5 + $0x160] ss:$16 sps:$4 sm:$0xff]  }
  0x6d   :  { %568 = vmatprep.subr.bf16.mxu0 %v2509_v44  ;;  %3537 = vst [vmem:[#allocation120_spill] sm:$0xff] %v2585_v19  ;;  %v2587_v14 = vrot.slane %v213_v26, %v195_v17  ;;  %v2590_v16 = vld [vmem:[#allocation5 + $0x184] ss:$16 sps:$4 sm:$0xff]   ;;  %v2593_v13 = vld [vmem:[#allocation5 + $0x148] ss:$16 sps:$4 sm:$0xff]  }
  0x6e   :  { %608 = vmatpush1.bf16.msra.mxu1 %v2525_v37  ;;  %3539 = vst [vmem:[#allocation122_spill] sm:$0xff] %v2590_v16  ;;  %3540 = vst [vmem:[#allocation123_spill] sm:$0xff] %v2593_v13  ;;  %v2596_v15 = vld [vmem:[#allocation5 + $0x16c] ss:$16 sps:$4 sm:$0xff]   ;;  %v2599_v10 = vld [vmem:[#allocation5 + $0x180] ss:$16 sps:$4 sm:$0xff]  }
  0x6f   :  { %609 = vmatprep.subr.bf16.mxu1 %v2528_v39  ;;  %3538 = vst [vmem:[#allocation121_spill] sm:$0xff] %v2587_v14  ;;  %3541 = vst [vmem:[#allocation124_spill] sm:$0xff] %v2596_v15  ;;  %v2602_v12 = vld [vmem:[#allocation5 + $0x1a4] ss:$16 sps:$4 sm:$0xff]   ;;  %v2605_v14 = vld [vmem:[#allocation5 + $0x168] ss:$16 sps:$4 sm:$0xff]  }
  0x70   :  { %569 = vmatpush1.bf16.msra.mxu0 %v2519_v38  ;;  %3542 = vst [vmem:[#allocation125_spill] sm:$0xff] %v2599_v10  ;;  %3543 = vst [vmem:[#allocation126_spill] sm:$0xff] %v2602_v12  ;;  %v2608_v9 = vld [vmem:[#allocation5 + $0x18c] ss:$16 sps:$4 sm:$0xff]   ;;  %v2611_v11 = vld [vmem:[#allocation5 + $0x1a0] ss:$16 sps:$4 sm:$0xff]  }
  0x71   :  { %570 = vmatprep.subr.bf16.mxu0 %v2522_v40  ;;  %3544 = vst [vmem:[#allocation127_spill] sm:$0xff] %v2605_v14  ;;  %3545 = vst [vmem:[#allocation128_spill] sm:$0xff] %v2608_v9  ;;  %v2614_v6 = vld [vmem:[#allocation5 + $0x1c4] ss:$16 sps:$4 sm:$0xff]   ;;  %v2617_v8 = vld [vmem:[#allocation5 + $0x188] ss:$16 sps:$4 sm:$0xff]  }
  0x72   :  { %610 = vmatpush1.bf16.msra.mxu1 %v2537_v33  ;;  %3546 = vst [vmem:[#allocation129_spill] sm:$0xff] %v2611_v11  ;;  %3547 = vst [vmem:[#allocation130_spill] sm:$0xff] %v2614_v6  ;;  %v2620_v5 = vld [vmem:[#allocation5 + $0x1ac] ss:$16 sps:$4 sm:$0xff]   ;;  %v2623_v7 = vld [vmem:[#allocation5 + $0x1c0] ss:$16 sps:$4 sm:$0xff]  }
  0x73   :  { %611 = vmatprep.subr.bf16.mxu1 %v2540_v35  ;;  %3548 = vst [vmem:[#allocation131_spill] sm:$0xff] %v2617_v8  ;;  %3549 = vst [vmem:[#allocation132_spill] sm:$0xff] %v2620_v5  ;;  %v2626_v2 = vld [vmem:[#allocation5 + $0x1e4] ss:$16 sps:$4 sm:$0xff]   ;;  %v2629_v4 = vld [vmem:[#allocation5 + $0x1a8] ss:$16 sps:$4 sm:$0xff]  }
  0x74   :  { %571 = vmatpush1.bf16.msra.mxu0 %v2530_v34  ;;  %3550 = vst [vmem:[#allocation133_spill] sm:$0xff] %v2623_v7  ;;  %3551 = vst [vmem:[#allocation134_spill] sm:$0xff] %v2626_v2  ;;  %v2632_v1 = vld [vmem:[#allocation5 + $0x1cc] ss:$16 sps:$4 sm:$0xff]   ;;  %v2635_v3 = vld [vmem:[#allocation5 + $0x1e0] ss:$16 sps:$4 sm:$0xff]  }
  0x75   :  { %572 = vmatprep.subr.bf16.mxu0 %v2533_v36  ;;  %3552 = vst [vmem:[#allocation135_spill] sm:$0xff] %v2629_v4  ;;  %3553 = vst [vmem:[#allocation136_spill] sm:$0xff] %v2632_v1 }
  0x76   :  { %612 = vmatpush1.bf16.msra.mxu1 %v2549_v29  ;;  %3554 = vst [vmem:[#allocation137_spill] sm:$0xff] %v2635_v3 }
  0x77   :  { %613 = vmatprep.subr.bf16.mxu1 %v2552_v31 }
  0x78   :  { %573 = vmatpush1.bf16.msra.mxu0 %v2543_v30 }
  0x79   :  { %574 = vmatprep.subr.bf16.mxu0 %v2546_v32 }
  0x7a   :  { %614 = vmatpush1.bf16.msra.mxu1 %v2561_v27 }
  0x7b   :  { %615 = vmatprep.subr.bf16.mxu1 %v2564_v22 }
  0x7c   :  { %575 = vmatpush1.bf16.msra.mxu0 %v2554_v28 }
  0x7d   :  { %576 = vmatprep.subr.bf16.mxu0 %v2557_v25 }
  0x7e   :  { %616 = vmatpush1.bf16.msra.mxu1 %v2575_v18 }
  0x7f   :  { %617 = vmatprep.subr.bf16.mxu1 %v2578_v20 }
  0x80   :  { %577 = vmatpush1.bf16.msra.mxu0 %v2569_v21 }
  0x81   :  { %578 = vmatprep.subr.bf16.mxu0 %v2572_v23 }
  0x82   :  { %618 = vmatpush1.bf16.msra.mxu1 %v2593_v13 }
  0x83   :  { %619 = vmatprep.subr.bf16.mxu1 %v2596_v15 }
  0x84   :  { %579 = vmatpush1.bf16.msra.mxu0 %v2585_v19 }
  0x85   :  { %580 = vmatprep.subr.bf16.mxu0 %v2590_v16 }
  0x86   :  { %620 = vmatpush1.bf16.msra.mxu1 %v2605_v14 }
  0x87   :  { %621 = vmatprep.subr.bf16.mxu1 %v2608_v9 }
  0x88   :  { %581 = vmatpush1.bf16.msra.mxu0 %v2599_v10 }
  0x89   :  { %582 = vmatprep.subr.bf16.mxu0 %v2602_v12  ;;  %v235_v12 = vld [vmem:[#allocation2] sm:$0x1] }
  0x8a   :  { %622 = vmatpush1.bf16.msra.mxu1 %v2617_v8 }
  0x8b   :  { %623 = vmatprep.subr.bf16.mxu1 %v2620_v5  ;;  %v2646_v5 = vld [vmem:[#allocation5 + $0x1e8] ss:$16 sps:$4 sm:$0xff]  }
  0x8c   :  { %583 = vmatpush1.bf16.msra.mxu0 %v2611_v11  ;;  %v2639_v11 = vld [vmem:[#allocation5 + $0x1c8] ss:$16 sps:$4 sm:$0xff]   ;;  %3557 = vst [vmem:[#allocation140_spill] sm:$0xff] %v2646_v5 }
  0x8d   :  { %584 = vmatprep.subr.bf16.mxu0 %v2614_v6  ;;  %3555 = vst [vmem:[#allocation138_spill] sm:$0xff] %v2639_v11  ;;  %v2642_v6 = vld [vmem:[#allocation5 + $0x1ec] ss:$16 sps:$4 sm:$0xff]  }
  0x8e   :  { %624 = vmatpush1.bf16.msra.mxu1 %v2629_v4  ;;  %3556 = vst [vmem:[#allocation139_spill] sm:$0xff] %v2642_v6 }
  0x8f   :  { %625 = vmatprep.subr.bf16.mxu1 %v2632_v1  ;;  %v203_v1 = vsub.s32 2, %v2566_v24 }
  0x90   :  { %585 = vmatpush1.bf16.msra.mxu0 %v2623_v7 }
  0x91   :  { %586 = vmatprep.subr.bf16.mxu0 %v2626_v2  ;;  %v199_v2 = vsub.s32 1, %v2566_v24  ;;  %v2654_v4 = vrot.slane %v213_v26, %v203_v1 }
  0x92   :  { %626 = vmatpush1.bf16.msra.mxu1 %v2639_v11 }
  0x93   :  { %627 = vmatprep.subr.bf16.mxu1 %v2642_v6  ;;  %v2651_v7 = vrot.slane %v213_v26, %v199_v2  ;;  %3559 = vst [vmem:[#allocation142_spill] sm:$0xff] %v2654_v4  ;;  %v191_v6 = vld [vmem:[%s3205_s2] sm:$0xf]  ;;  %s2682_s2 = smov 0  }
  0x94   :  { %587 = vmatpush1.bf16.msra.mxu0 %v2635_v3  ;;  %v207_v3 = vsub.s32 3, %v2566_v24  ;;  %v2662_v11 = vrot.slane %v191_v6, %v195_v17  ;;  %v2671_v15 = vrot.slane %v191_v6, %v203_v1 }
  0x95   :  { %3558 = vst [vmem:[#allocation141_spill] sm:$0xff] %v2651_v7 }
  0x96   :  { %628 = vmatpush1.bf16.msra.mxu1 %v2646_v5  ;;  %v2657_v8 = vrot.slane %v213_v26, %v207_v3  ;;  %3561 = vst [vmem:[#allocation144_spill] sm:$0xff] %v2662_v11  ;;  %v2664_v5 = vrot.slane %v191_v6, %v199_v2  ;;  %v2668_v24 = vrot.slane %v191_v6, %v207_v3  ;;  %3564 = vst [vmem:[#allocation147_spill] sm:$0xff] %v2671_v15 }
  0x97   :  { %589 = vmatmul.mubr.bf16.vlgmr.msra.gmra.mrb[0].mxu0 %v235_v12 }
  0x98   :  { %3560 = vst [vmem:[#allocation143_spill] sm:$0xff] %v2657_v8  ;;  %3562 = vst [vmem:[#allocation145_spill] sm:$0xff] %v2664_v5 }
  0x99   :  { %630 = vmatmul.mubr.bf16.vlgmr.msra.gmra.mrb[0].mxu1 %v235_v12  ;;  %3563 = vst [vmem:[#allocation146_spill] sm:$0xff] %v2668_v24 }
 0x16a   :  { %v590_v12 = vpop.f32.mrb[0].mxu0 }
 0x16b   :  { %v591_v10 = vadd.f32 %v590_v12, %v2662_v11  ;;  %v592_v7 = vpop.f32.mrb[1].mxu0 }
 0x16c   :  { %v593_v9 = vadd.f32 %v592_v7, %v2664_v5  ;;  %v594_v16 = vpop.f32.mrb[2].mxu0  ;;  %v631_v8 = vpop.f32.mrb[0].mxu1 }
 0x16d   :  { %v1750_v4 = vmul.f32 -1.442695, %v591_v10  ;;  %v595_v14 = vpop.f32.mrb[3].mxu0  ;;  %v633_v19 = vpop.f32.mrb[1].mxu1  ;;  %v632_v11 = vadd.f32 %v631_v8, %v2671_v15 }
 0x16e   :  { %v1751_v26 = vmul.f32 -1.442695, %v593_v9  ;;  %v634_v17 = vadd.f32 %v633_v19, %v2668_v24  ;;  %v635_v2 = vpop.f32.mrb[2].mxu1 }
 0x16f   :  { %2040 = vpow2.f32 %v1750_v4  ;;  %v636_v23 = vpop.f32.mrb[3].mxu1 }
 0x170   :  { %2042 = vpow2.f32 %v1751_v26  ;;  %v1752_v12 = vmul.f32 -1.442695, %v634_v17 }
 0x172   :  { %2044 = vpow2.f32 %v1752_v12  ;;  %v2674_v12 = vmov 0.0  }
 0x173   :  { %2046 = vtanh.f32 %v632_v11 }
 0x179   :  { %v2041_v7 = vpop.eup %2040 }
 0x17a   :  { %v2043_v10 = vpop.eup %2042  ;;  %v641_v14 = vadd.f32 1.0, %v2041_v7  ;;  %v2676_v7 = vmov 0.0  }
 0x17b   :  { %v647_v3 = vadd.f32 1.0, %v2043_v10 }
 0x17c   :  { %2048 = vrcp.f32 %v641_v14  ;;  %v2045_v4 = vpop.eup %2044 }
 0x17d   :  { %2050 = vrcp.f32 %v647_v3  ;;  %v2047_v9 = vpop.eup %2046  ;;  %v654_v26 = vadd.f32 1.0, %v2045_v4 }
 0x17f   :  { %2052 = vrcp.f32 %v654_v26 }
 0x186   :  { %v2049_v16 = vpop.eup %2048 }
 0x187   :  { %v2051_v19 = vpop.eup %2050  ;;  %v658_v2 = vmul.f32 %v2049_v16, %v2047_v9 }
 0x188   :  { %v657_v1 = vmul.f32 0.0, %v2051_v19 }
 0x189   :  { %v2053_v23 = vpop.eup %2052 }
 0x18a   :  { %v659_v6 = vadd.f32 %v658_v2, %v657_v1  }
 0x18c   :  { %2054 = vtanh.f32 %v659_v6 }
 0x196   :  { %v2055_v8 = vpop.eup %2054 }
 0x197   :  { %v661_v17 = vmul.f32 %v2055_v8, %v2053_v23  }
 0x198 LB: > { %v3565_v54 = vld [vmem:[#allocation76_spill] sm:$0xff]  ;;  %v3566_v62 = vld [vmem:[#allocation81_spill] sm:$0xff]  ;;  %v3568_v63 = vld [vmem:[#allocation82_spill] sm:$0xff]  ;;  %v2703_v11 = vpack.c.bf16 %v2232_v17, %v2232_v17  ;;  %s1665_s7 = scalar_lea.vmem [#allocation2], %s2236_s2  ;;  %p1824_p10 = scmp.lt.s32.totalorder %s2236_s2, 4  ;;  %s2236_s2 = sphi %s2682_s2, %s667_s2   ;;  %v2232_v17 = vphi %v661_v17, %v3757_v17   ;;  %v2228_v6 = vphi %v659_v6, %v779_v6   ;;  %v2224_v7 = vphi %v2676_v7, %v3756_v7   ;;  %v2220_v12 = vphi %v2674_v12, %v3755_v12  }
 0x199   : > { %676 = vmatprep.subr.bf16.mxu0 %v3565_v54  ;;  %717 = vmatprep.subr.bf16.mxu1 %v3566_v62  ;;  %v3567_v53 = vld [vmem:[#allocation77_spill] sm:$0xff]  ;;  %v3569_v56 = vld [vmem:[#allocation78_spill] sm:$0xff]  ;;  %v3570_v60 = vld [vmem:[#allocation84_spill] sm:$0xff]  ;;  %s1825_s8 = sadd.s32 (!%p1824_p10), 4294967292, %s2236_s2 }
 0x19a   : > { %677 = vmatpush1.bf16.msra.mxu0 %v3567_v53  ;;  %718 = vmatpush1.bf16.msra.mxu1 %v3568_v63  ;;  %v3571_v58 = vld [vmem:[#allocation79_spill] sm:$0xff]  ;;  %v3572_v59 = vld [vmem:[#allocation86_spill] sm:$0xff]  ;;  %v3573_v61 = vld [vmem:[#allocation80_spill] sm:$0xff]  ;;  %s1826_s9 = sshll.u32 (!%p1824_p10), %s1825_s8, 1 }
 0x19b   : > { %678 = vmatprep.subr.bf16.mxu0 %v3569_v56  ;;  %719 = vmatprep.subr.bf16.mxu1 %v3570_v60  ;;  %v3574_v50 = vld [vmem:[#allocation88_spill] sm:$0xff]  ;;  %v3575_v0 = vld [vmem:[#allocation83_spill] sm:$0xff]  ;;  %v3576_v49 = vld [vmem:[#allocation90_spill] sm:$0xff]  ;;  %s1215_s10 = scalar_lea.vmem (!%p1824_p10), [#allocation8], %s1826_s9 }
 0x19c   : > { %708 = vmatprep.mubr.bf16.mxu0 %v2703_v11  ;;  %749 = vmatprep.mubr.bf16.mxu1 %v2703_v11  ;;  %v3577_v57 = vld [vmem:[#allocation85_spill] sm:$0xff]  ;;  %v3578_v51 = vld [vmem:[#allocation91_spill] sm:$0xff]  ;;  %v3580_v45 = vld [vmem:[#allocation94_spill] sm:$0xff] }
 0x19d   : > { %v3579_v55 = vld [vmem:[#allocation87_spill] sm:$0xff]  ;;  %v3581_v52 = vld [vmem:[#allocation89_spill] sm:$0xff]  ;;  %v3583_v46 = vld [vmem:[#allocation92_spill] sm:$0xff] }
 0x19e   : > { %679 = vmatpush1.bf16.msra.mxu0 %v3571_v58  ;;  %720 = vmatpush1.bf16.msra.mxu1 %v3572_v59  ;;  %v3582_v47 = vld [vmem:[#allocation95_spill] sm:$0xff]  ;;  %v3584_v41 = vld [vmem:[#allocation98_spill] sm:$0xff]  ;;  %v3585_v48 = vld [vmem:[#allocation93_spill] sm:$0xff] }
 0x19f   : > { %680 = vmatprep.subr.bf16.mxu0 %v3573_v61  ;;  %721 = vmatprep.subr.bf16.mxu1 %v3574_v50  ;;  %v3586_v43 = vld [vmem:[#allocation99_spill] sm:$0xff]  ;;  %v3587_v42 = vld [vmem:[#allocation96_spill] sm:$0xff]  ;;  %v3588_v37 = vld [vmem:[#allocation102_spill] sm:$0xff] }
 0x1a0   : > { %v3589_v44 = vld [vmem:[#allocation97_spill] sm:$0xff]  ;;  %v3590_v39 = vld [vmem:[#allocation103_spill] sm:$0xff]  ;;  %v3591_v38 = vld [vmem:[#allocation100_spill] sm:$0xff] }
 0x1a1   : > { %v3592_v33 = vld [vmem:[#allocation106_spill] sm:$0xff]  ;;  %v3593_v40 = vld [vmem:[#allocation101_spill] sm:$0xff]  ;;  %v3594_v35 = vld [vmem:[#allocation107_spill] sm:$0xff] }
 0x1a2   : > { %681 = vmatpush1.bf16.msra.mxu0 %v3575_v0  ;;  %722 = vmatpush1.bf16.msra.mxu1 %v3576_v49  ;;  %v3595_v34 = vld [vmem:[#allocation104_spill] sm:$0xff]  ;;  %v3596_v29 = vld [vmem:[#allocation110_spill] sm:$0xff]  ;;  %v3597_v36 = vld [vmem:[#allocation105_spill] sm:$0xff] }
 0x1a3   : > { %682 = vmatprep.subr.bf16.mxu0 %v3577_v57  ;;  %723 = vmatprep.subr.bf16.mxu1 %v3578_v51  ;;  %v3598_v31 = vld [vmem:[#allocation111_spill] sm:$0xff]  ;;  %v3599_v30 = vld [vmem:[#allocation108_spill] sm:$0xff]  ;;  %v3600_v27 = vld [vmem:[#allocation114_spill] sm:$0xff] }
 0x1a4   : > { %v3601_v32 = vld [vmem:[#allocation109_spill] sm:$0xff]  ;;  %v3602_v22 = vld [vmem:[#allocation115_spill] sm:$0xff]  ;;  %v3603_v28 = vld [vmem:[#allocation112_spill] sm:$0xff] }
 0x1a5   : > { %v3604_v18 = vld [vmem:[#allocation118_spill] sm:$0xff]  ;;  %v3605_v25 = vld [vmem:[#allocation113_spill] sm:$0xff]  ;;  %v3606_v20 = vld [vmem:[#allocation119_spill] sm:$0xff] }
 0x1a6   : > { %683 = vmatpush1.bf16.msra.mxu0 %v3579_v55  ;;  %724 = vmatpush1.bf16.msra.mxu1 %v3580_v45  ;;  %v3607_v21 = vld [vmem:[#allocation116_spill] sm:$0xff]  ;;  %v3608_v13 = vld [vmem:[#allocation123_spill] sm:$0xff]  ;;  %v3609_v10 = vld [vmem:[#allocation117_spill] sm:$0xff] }
 0x1a7   : > { %684 = vmatprep.subr.bf16.mxu0 %v3581_v52  ;;  %725 = vmatprep.subr.bf16.mxu1 %v3582_v47  ;;  %v3610_v14 = vld [vmem:[#allocation124_spill] sm:$0xff]  ;;  %v3612_v4 = vld [vmem:[#allocation127_spill] sm:$0xff]  ;;  %v3613_v9 = vld [vmem:[#allocation122_spill] sm:$0xff] }
 0x1a8   : > { %v3611_v3 = vld [vmem:[#allocation120_spill] sm:$0xff]  ;;  %v3615_v26 = vld [vmem:[#allocation125_spill] sm:$0xff]  ;;  %v3616_v19 = vld [vmem:[#allocation131_spill] sm:$0xff] }
 0x1a9   : > { %v3614_v16 = vld [vmem:[#allocation128_spill] sm:$0xff]  ;;  %v3617_v2 = vld [vmem:[#allocation126_spill] sm:$0xff]  ;;  %v3619_v23 = vld [vmem:[#allocation129_spill] sm:$0xff] }
 0x1aa   : > { %685 = vmatpush1.bf16.msra.mxu0 %v3583_v46  ;;  %726 = vmatpush1.bf16.msra.mxu1 %v3584_v41  ;;  %v3618_v1 = vld [vmem:[#allocation132_spill] sm:$0xff]  ;;  %v3620_v8 = vld [vmem:[#allocation135_spill] sm:$0xff]  ;;  %v3621_v17 = vld [vmem:[#allocation130_spill] sm:$0xff] }
 0x1ab   : > { %686 = vmatprep.subr.bf16.mxu0 %v3585_v48  ;;  %727 = vmatprep.subr.bf16.mxu1 %v3586_v43  ;;  %v3678_v48 = vld [vmem:[#allocation45_spill] sm:$0xff]  ;;  %v3747_v24 = vld [vmem:[#allocation146_spill] sm:$0xff]  ;;  %v3748_v15 = vld [vmem:[#allocation147_spill] sm:$0xff] }
 0x1ac   : > { %v3684_v52 = vld [vmem:[#allocation49_spill] sm:$0xff] }
 0x1ad   : > { %v3691_v56 = vld [vmem:[#allocation53_spill] sm:$0xff] }
 0x1ae   : > { %687 = vmatpush1.bf16.msra.mxu0 %v3587_v42  ;;  %728 = vmatpush1.bf16.msra.mxu1 %v3588_v37  ;;  %v3701_v60 = vld [vmem:[#allocation57_spill] sm:$0xff] }
 0x1af   : > { %688 = vmatprep.subr.bf16.mxu0 %v3589_v44  ;;  %729 = vmatprep.subr.bf16.mxu1 %v3590_v39  ;;  %v3672_v44 = vld [vmem:[#allocation41_spill] sm:$0xff] }
 0x1b0   : > { %v3746_v5 = vld [vmem:[#allocation145_spill] sm:$0xff] }
 0x1b2   : > { %689 = vmatpush1.bf16.msra.mxu0 %v3591_v38  ;;  %730 = vmatpush1.bf16.msra.mxu1 %v3592_v33 }
 0x1b3   : > { %690 = vmatprep.subr.bf16.mxu0 %v3593_v40  ;;  %731 = vmatprep.subr.bf16.mxu1 %v3594_v35  ;;  %v3666_v40 = vld [vmem:[#allocation37_spill] sm:$0xff] }
 0x1b6   : > { %691 = vmatpush1.bf16.msra.mxu0 %v3595_v34  ;;  %732 = vmatpush1.bf16.msra.mxu1 %v3596_v29 }
 0x1b7   : > { %692 = vmatprep.subr.bf16.mxu0 %v3597_v36  ;;  %733 = vmatprep.subr.bf16.mxu1 %v3598_v31  ;;  %v3660_v36 = vld [vmem:[#allocation33_spill] sm:$0xff] }
 0x1ba   : > { %693 = vmatpush1.bf16.msra.mxu0 %v3599_v30  ;;  %734 = vmatpush1.bf16.msra.mxu1 %v3600_v27 }
 0x1bb   : > { %694 = vmatprep.subr.bf16.mxu0 %v3601_v32  ;;  %735 = vmatprep.subr.bf16.mxu1 %v3602_v22  ;;  %v3654_v32 = vld [vmem:[#allocation29_spill] sm:$0xff] }
 0x1be   : > { %695 = vmatpush1.bf16.msra.mxu0 %v3603_v28  ;;  %736 = vmatpush1.bf16.msra.mxu1 %v3604_v18 }
 0x1bf   : > { %696 = vmatprep.subr.bf16.mxu0 %v3605_v25  ;;  %737 = vmatprep.subr.bf16.mxu1 %v3606_v20 }
 0x1c2   : > { %697 = vmatpush1.bf16.msra.mxu0 %v3607_v21  ;;  %738 = vmatpush1.bf16.msra.mxu1 %v3608_v13  ;;  %v3636_v13 = vld [vmem:[#allocation17_spill] sm:$0xff] }
 0x1c3   : > { %698 = vmatprep.subr.bf16.mxu0 %v3609_v10  ;;  %739 = vmatprep.subr.bf16.mxu1 %v3610_v14  ;;  %v3622_v10 = vld [vmem:[#allocation136_spill] sm:$0xff]  ;;  %v3623_v14 = vld [vmem:[#allocation133_spill] sm:$0xff] }
 0x1c6   : > { %699 = vmatpush1.bf16.msra.mxu0 %v3611_v3  ;;  %740 = vmatpush1.bf16.msra.mxu1 %v3612_v4  ;;  %v3624_v3 = vld [vmem:[#allocation138_spill] sm:$0xff] }
 0x1c7   : > { %700 = vmatprep.subr.bf16.mxu0 %v3613_v9  ;;  %741 = vmatprep.subr.bf16.mxu1 %v3614_v16  ;;  %v3625_v4 = vld [vmem:[#allocation134_spill] sm:$0xff]  ;;  %v3627_v16 = vld [vmem:[#allocation12_spill] sm:$0xff] }
 0x1c8   : > { %v3626_v9 = vld [vmem:[#allocation14_spill] sm:$0xff] }
 0x1ca   : > { %701 = vmatpush1.bf16.msra.mxu0 %v3615_v26  ;;  %742 = vmatpush1.bf16.msra.mxu1 %v3616_v19  ;;  %v2764_v26 = vcombine.high %v3627_v16, %v3626_v9  ;;  %v3628_v19 = vld [vmem:[#allocation139_spill] sm:$0xff] }
 0x1cb   : > { %702 = vmatprep.subr.bf16.mxu0 %v3617_v2  ;;  %743 = vmatprep.subr.bf16.mxu1 %v3618_v1  ;;  %v3629_v2 = vld [vmem:[#allocation15_spill] sm:$0xff]  ;;  %v3630_v1 = vld [vmem:[#allocation13_spill] sm:$0xff] }
 0x1ce   : > { %703 = vmatpush1.bf16.msra.mxu0 %v3619_v23  ;;  %744 = vmatpush1.bf16.msra.mxu1 %v3620_v8  ;;  %v2769_v23 = vcombine.high %v3630_v1, %v3629_v2  ;;  %v3631_v8 = vld [vmem:[#allocation137_spill] sm:$0xff] }
 0x1cf   : > { %704 = vmatprep.subr.bf16.mxu0 %v3621_v17  ;;  %745 = vmatprep.subr.bf16.mxu1 %v3622_v10  ;;  %v1753_v17 = vld [vmem:[%s1665_s7 + $0x1] sm:$0x1]  ;;  %v2775_v10 = vcombine.low %v3627_v16, %v3626_v9  ;;  %v782_v9 = vpack.c.bf16 %v2224_v7, %v2224_v7  ;;  %v3638_v16 = vld [vmem:[#allocation20_spill] sm:$0xff]  ;;  %v3639_v7 = vld [vmem:[#allocation23_spill] sm:$0xff] }
 0x1d0   : > { %v3640_v21 = vmov %v3639_v7 }
 0x1d2   : > { %705 = vmatpush1.bf16.msra.mxu0 %v3623_v14  ;;  %746 = vmatpush1.bf16.msra.mxu1 %v3624_v3  ;;  %v3632_v14 = vld [vmem:[#allocation140_spill] sm:$0xff]  ;;  %v2780_v3 = vcombine.low %v3630_v1, %v3629_v2  ;;  %v3637_v2 = vld [vmem:[#allocation22_spill] sm:$0xff] }
 0x1d3   : > { %706 = vmatprep.subr.bf16.mxu0 %v3625_v4  ;;  %747 = vmatprep.subr.bf16.mxu1 %v3628_v19  ;;  %v3633_v4 = vld [vmem:[#allocation18_spill] sm:$0xff]  ;;  %v3634_v19 = vld [vmem:[#allocation16_spill] sm:$0xff]  ;;  %v2807_v20 = vcombine.high %v3638_v16, %v3637_v2 }
 0x1d4   : > { %v2785_v0 = vcombine.high %v3634_v19, %v3633_v4 }
 0x1d6   : > { %707 = vmatpush1.bf16.msra.mxu0 %v3631_v8  ;;  %748 = vmatpush1.bf16.msra.mxu1 %v3632_v14  ;;  %v3635_v8 = vld [vmem:[#allocation19_spill] sm:$0xff]  ;;  %v2797_v14 = vcombine.low %v3634_v19, %v3633_v4  ;;  %v2817_v4 = vcombine.low %v3638_v16, %v3637_v2  ;;  %v3644_v19 = vld [vmem:[#allocation24_spill] sm:$0xff] }
 0x1d7   : > { %1103 = vmatprep.subr.bf16.mxu0 %v2764_v26  ;;  %1144 = vmatprep.subr.bf16.mxu1 %v2769_v23  ;;  %v2790_v18 = vcombine.high %v3636_v13, %v3635_v8  ;;  %v2802_v1 = vcombine.low %v3636_v13, %v3635_v8  ;;  %v3643_v13 = vld [vmem:[#allocation26_spill] sm:$0xff] }
 0x1d8   : > { %v2837_v2 = vcombine.low %v3644_v19, %v3643_v13 }
 0x1d9   : > { %709 = vmatmul.mubr.bf16.vlgmr.msra.gmra.mrb[0].mxu0 %v1753_v17  ;;  %750 = vmatmul.mubr.bf16.vlgmr.msra.gmra.mrb[0].mxu1 %v1753_v17  ;;  %v3641_v17 = vld [vmem:[#allocation21_spill] sm:$0xff] }
 0x1da   : > { %1104 = vmatpush1.bf16.msra.mxu0 %v2775_v10  ;;  %1145 = vmatpush1.bf16.msra.mxu1 %v2780_v3  ;;  %v3642_v22 = vmov %v3641_v17  ;;  %v2812_v25 = vcombine.high %v3641_v17, %v3639_v7  ;;  %v2827_v7 = vcombine.high %v3644_v19, %v3643_v13  ;;  %v3647_v17 = vld [vmem:[#allocation25_spill] sm:$0xff] }
 0x1db   : > { %1105 = vmatprep.subr.bf16.mxu0 %v2785_v0  ;;  %1146 = vmatprep.subr.bf16.mxu1 %v2790_v18  ;;  %v2822_v8 = vcombine.low %v3642_v22, %v3640_v21  ;;  %v3648_v28 = vmov %v3647_v17  ;;  %v3651_v22 = vld [vmem:[#allocation28_spill] sm:$0xff] }
 0x1dc   : > { %1135 = vmatprep.mubr.bf16.mxu0 %v782_v9  ;;  %1176 = vmatprep.mubr.bf16.mxu1 %v782_v9  ;;  %v3645_v27 = vmov %v2827_v7  ;;  %v3646_v9 = vld [vmem:[#allocation27_spill] sm:$0xff]  ;;  %v3649_v7 = vld [vmem:[#allocation30_spill] sm:$0xff] }
 0x1dd   : > { %v2832_v29 = vcombine.high %v3647_v17, %v3646_v9  ;;  %v2842_v16 = vcombine.low %v3648_v28, %v3646_v9  ;;  %v3650_v21 = vmov %v3649_v7  ;;  %v2847_v30 = vcombine.high %v3651_v22, %v3649_v7  ;;  %v3652_v17 = vld [vmem:[#allocation31_spill] sm:$0xff]  ;;  %v3655_v7 = vld [vmem:[#allocation34_spill] sm:$0xff]  ;;  %v3657_v28 = vld [vmem:[#allocation32_spill] sm:$0xff] }
 0x1de   : > { %1106 = vmatpush1.bf16.msra.mxu0 %v2797_v14  ;;  %1147 = vmatpush1.bf16.msra.mxu1 %v2802_v1  ;;  %v3653_v31 = vmov %v3652_v17  ;;  %v2852_v33 = vcombine.high %v3654_v32, %v3652_v17  ;;  %v2857_v13 = vcombine.low %v3651_v22, %v3650_v21  ;;  %v3656_v19 = vmov %v3655_v7  ;;  %v3658_v17 = vld [vmem:[#allocation35_spill] sm:$0xff] }
 0x1df   : > { %1107 = vmatprep.subr.bf16.mxu0 %v2807_v20  ;;  %1148 = vmatprep.subr.bf16.mxu1 %v2812_v25  ;;  %v2862_v9 = vcombine.low %v3654_v32, %v3653_v31  ;;  %v2867_v34 = vcombine.high %v3657_v28, %v3655_v7  ;;  %v3659_v35 = vmov %v3658_v17  ;;  %v2872_v37 = vcombine.high %v3660_v36, %v3658_v17  ;;  %v3661_v7 = vld [vmem:[#allocation38_spill] sm:$0xff]  ;;  %v3663_v32 = vld [vmem:[#allocation36_spill] sm:$0xff]  ;;  %v3664_v17 = vld [vmem:[#allocation39_spill] sm:$0xff] }
 0x1e0   : > { %v2877_v21 = vcombine.low %v3657_v28, %v3656_v19  ;;  %v2882_v22 = vcombine.low %v3660_v36, %v3659_v35  ;;  %v3662_v31 = vmov %v3661_v7  ;;  %v2887_v38 = vcombine.high %v3663_v32, %v3661_v7  ;;  %v3667_v7 = vld [vmem:[#allocation42_spill] sm:$0xff]  ;;  %v3669_v36 = vld [vmem:[#allocation40_spill] sm:$0xff] }
 0x1e1   : > { %v3665_v39 = vmov %v3664_v17  ;;  %v2892_v41 = vcombine.high %v3666_v40, %v3664_v17  ;;  %v2897_v19 = vcombine.low %v3663_v32, %v3662_v31  ;;  %v3668_v35 = vmov %v3667_v7  ;;  %v3670_v17 = vld [vmem:[#allocation43_spill] sm:$0xff] }
 0x1e2   : > { %1108 = vmatpush1.bf16.msra.mxu0 %v2817_v4  ;;  %1149 = vmatpush1.bf16.msra.mxu1 %v2822_v8  ;;  %v2902_v28 = vcombine.low %v3666_v40, %v3665_v39  ;;  %v2907_v42 = vcombine.high %v3669_v36, %v3667_v7  ;;  %v3671_v43 = vmov %v3670_v17  ;;  %v2912_v45 = vcombine.high %v3672_v44, %v3670_v17  ;;  %v3673_v7 = vld [vmem:[#allocation46_spill] sm:$0xff]  ;;  %v3675_v40 = vld [vmem:[#allocation44_spill] sm:$0xff]  ;;  %v3676_v17 = vld [vmem:[#allocation47_spill] sm:$0xff] }
 0x1e3   : > { %1109 = vmatprep.subr.bf16.mxu0 %v3645_v27  ;;  %1150 = vmatprep.subr.bf16.mxu1 %v2832_v29  ;;  %v2917_v31 = vcombine.low %v3669_v36, %v3668_v35  ;;  %v2922_v32 = vcombine.low %v3672_v44, %v3671_v43  ;;  %v3674_v39 = vmov %v3673_v7  ;;  %v2927_v46 = vcombine.high %v3675_v40, %v3673_v7  ;;  %v3679_v7 = vld [vmem:[#allocation50_spill] sm:$0xff]  ;;  %v3681_v44 = vld [vmem:[#allocation48_spill] sm:$0xff] }
 0x1e4   : > { %v3677_v47 = vmov %v3676_v17  ;;  %v2932_v49 = vcombine.high %v3678_v48, %v3676_v17  ;;  %v2937_v35 = vcombine.low %v3675_v40, %v3674_v39  ;;  %v3680_v43 = vmov %v3679_v7  ;;  %v3682_v17 = vld [vmem:[#allocation51_spill] sm:$0xff] }
 0x1e5   : > { %v2942_v36 = vcombine.low %v3678_v48, %v3677_v47  ;;  %v2947_v50 = vcombine.high %v3681_v44, %v3679_v7  ;;  %v3683_v51 = vmov %v3682_v17  ;;  %v2952_v53 = vcombine.high %v3684_v52, %v3682_v17  ;;  %v3685_v7 = vld [vmem:[#allocation54_spill] sm:$0xff]  ;;  %v3687_v48 = vld [vmem:[#allocation52_spill] sm:$0xff]  ;;  %v3689_v17 = vld [vmem:[#allocation55_spill] sm:$0xff] }
 0x1e6   : > { %1110 = vmatpush1.bf16.msra.mxu0 %v2837_v2  ;;  %1151 = vmatpush1.bf16.msra.mxu1 %v2842_v16  ;;  %v2957_v39 = vcombine.low %v3681_v44, %v3680_v43  ;;  %v2962_v40 = vcombine.low %v3684_v52, %v3683_v51  ;;  %v3686_v47 = vmov %v3685_v7  ;;  %v2967_v54 = vcombine.high %v3687_v48, %v3685_v7  ;;  %v3695_v7 = vld [vmem:[#allocation58_spill] sm:$0xff]  ;;  %v3697_v52 = vld [vmem:[#allocation56_spill] sm:$0xff] }
 0x1e7   : > { %1111 = vmatprep.subr.bf16.mxu0 %v2847_v30  ;;  %1152 = vmatprep.subr.bf16.mxu1 %v2852_v33  ;;  %v3690_v55 = vmov %v3689_v17  ;;  %v2972_v57 = vcombine.high %v3691_v56, %v3689_v17  ;;  %v2977_v43 = vcombine.low %v3687_v48, %v3686_v47  ;;  %v3696_v51 = vmov %v3695_v7  ;;  %v3699_v17 = vld [vmem:[#allocation59_spill] sm:$0xff] }
 0x1e8   : > { %3688 = vst [vmem:[#allocation148_spill] sm:$0xff] %v2967_v54  ;;  %v2982_v44 = vcombine.low %v3691_v56, %v3690_v55  ;;  %v2987_v58 = vcombine.high %v3697_v52, %v3695_v7  ;;  %v3700_v59 = vmov %v3699_v17  ;;  %v2992_v61 = vcombine.high %v3701_v60, %v3699_v17  ;;  %v3705_v7 = vld [vmem:[#allocation62_spill] sm:$0xff]  ;;  %v3707_v56 = vld [vmem:[#allocation60_spill] sm:$0xff]  ;;  %v3709_v17 = vld [vmem:[#allocation63_spill] sm:$0xff] }
 0x1e9   : > { %3692 = vst [vmem:[#allocation149_spill] sm:$0xff] %v2972_v57  ;;  %3693 = vst [vmem:[#allocation150_spill] sm:$0xff] %v2977_v43  ;;  %v2997_v47 = vcombine.low %v3697_v52, %v3696_v51  ;;  %v3002_v48 = vcombine.low %v3701_v60, %v3700_v59  ;;  %v3706_v55 = vmov %v3705_v7  ;;  %v3007_v62 = vcombine.high %v3707_v56, %v3705_v7  ;;  %v3715_v7 = vld [vmem:[#allocation66_spill] sm:$0xff]  ;;  %v3717_v60 = vld [vmem:[#allocation64_spill] sm:$0xff] }
 0x1ea   : > { %1112 = vmatpush1.bf16.msra.mxu0 %v2857_v13  ;;  %1153 = vmatpush1.bf16.msra.mxu1 %v2862_v9  ;;  %3694 = vst [vmem:[#allocation151_spill] sm:$0xff] %v2982_v44  ;;  %3698 = vst [vmem:[#allocation152_spill] sm:$0xff] %v2987_v58  ;;  %v3710_v63 = vmov %v3709_v17  ;;  %v3017_v51 = vcombine.low %v3707_v56, %v3706_v55  ;;  %v3716_v59 = vmov %v3715_v7 }
 0x1eb   : > { %1113 = vmatprep.subr.bf16.mxu0 %v2867_v34  ;;  %1154 = vmatprep.subr.bf16.mxu1 %v2872_v37  ;;  %3702 = vst [vmem:[#allocation153_spill] sm:$0xff] %v2992_v61  ;;  %3703 = vst [vmem:[#allocation154_spill] sm:$0xff] %v2997_v47  ;;  %v3037_v55 = vcombine.low %v3717_v60, %v3716_v59 }
 0x1ec   : > { %3704 = vst [vmem:[#allocation155_spill] sm:$0xff] %v3002_v48  ;;  %3708 = vst [vmem:[#allocation156_spill] sm:$0xff] %v3007_v62 }
 0x1ed   : > { %3713 = vst [vmem:[#allocation158_spill] sm:$0xff] %v3017_v51  ;;  %3723 = vst [vmem:[#allocation162_spill] sm:$0xff] %v3037_v55 }
 0x1ee   : > { %1114 = vmatpush1.bf16.msra.mxu0 %v2877_v21  ;;  %1155 = vmatpush1.bf16.msra.mxu1 %v2882_v22 }
 0x1ef   : > { %1115 = vmatprep.subr.bf16.mxu0 %v2887_v38  ;;  %1156 = vmatprep.subr.bf16.mxu1 %v2892_v41 }
 0x1f2   : > { %1116 = vmatpush1.bf16.msra.mxu0 %v2897_v19  ;;  %1157 = vmatpush1.bf16.msra.mxu1 %v2902_v28 }
 0x1f3   : > { %1117 = vmatprep.subr.bf16.mxu0 %v2907_v42  ;;  %1158 = vmatprep.subr.bf16.mxu1 %v2912_v45 }
 0x1f6   : > { %1118 = vmatpush1.bf16.msra.mxu0 %v2917_v31  ;;  %1159 = vmatpush1.bf16.msra.mxu1 %v2922_v32 }
 0x1f7   : > { %1119 = vmatprep.subr.bf16.mxu0 %v2927_v46  ;;  %1160 = vmatprep.subr.bf16.mxu1 %v2932_v49 }
 0x1fa   : > { %1120 = vmatpush1.bf16.msra.mxu0 %v2937_v35  ;;  %1161 = vmatpush1.bf16.msra.mxu1 %v2942_v36 }
 0x1fb   : > { %1121 = vmatprep.subr.bf16.mxu0 %v2947_v50  ;;  %1162 = vmatprep.subr.bf16.mxu1 %v2952_v53 }
 0x1fe   : > { %1122 = vmatpush1.bf16.msra.mxu0 %v2957_v39  ;;  %1163 = vmatpush1.bf16.msra.mxu1 %v2962_v40 }
 0x1ff   : > { %1123 = vmatprep.subr.bf16.mxu0 %v2967_v54  ;;  %1164 = vmatprep.subr.bf16.mxu1 %v2972_v57 }
 0x202   : > { %1124 = vmatpush1.bf16.msra.mxu0 %v2977_v43  ;;  %1165 = vmatpush1.bf16.msra.mxu1 %v2982_v44  ;;  %v3711_v43 = vld [vmem:[#allocation61_spill] sm:$0xff] }
 0x203   : > { %1125 = vmatprep.subr.bf16.mxu0 %v2987_v58  ;;  %1166 = vmatprep.subr.bf16.mxu1 %v2992_v61  ;;  %v3012_v57 = vcombine.high %v3711_v43, %v3709_v17  ;;  %v3022_v52 = vcombine.low %v3711_v43, %v3710_v63  ;;  %v3027_v61 = vcombine.high %v3717_v60, %v3715_v7  ;;  %v3719_v17 = vld [vmem:[#allocation67_spill] sm:$0xff]  ;;  %v3725_v7 = vld [vmem:[#allocation70_spill] sm:$0xff]  ;;  %v3727_v63 = vld [vmem:[#allocation68_spill] sm:$0xff] }
 0x204   : > { %v3720_v58 = vmov %v3719_v17  ;;  %v3726_v56 = vmov %v3725_v7  ;;  %v3737_v60 = vld [vmem:[#allocation72_spill] sm:$0xff] }
 0x205   : > { %3712 = vst [vmem:[#allocation157_spill] sm:$0xff] %v3012_v57  ;;  %3714 = vst [vmem:[#allocation159_spill] sm:$0xff] %v3022_v52  ;;  %v3057_v59 = vcombine.low %v3727_v63, %v3726_v56 }
 0x206   : > { %1126 = vmatpush1.bf16.msra.mxu0 %v2997_v47  ;;  %1167 = vmatpush1.bf16.msra.mxu1 %v3002_v48  ;;  %3718 = vst [vmem:[#allocation160_spill] sm:$0xff] %v3027_v61  ;;  %v3721_v47 = vld [vmem:[#allocation65_spill] sm:$0xff] }
 0x207   : > { %1127 = vmatprep.subr.bf16.mxu0 %v3007_v62  ;;  %1168 = vmatprep.subr.bf16.mxu1 %v3012_v57  ;;  %v3032_v44 = vcombine.high %v3721_v47, %v3719_v17  ;;  %v3042_v43 = vcombine.low %v3721_v47, %v3720_v58  ;;  %v3047_v57 = vcombine.high %v3727_v63, %v3725_v7  ;;  %v3729_v17 = vld [vmem:[#allocation71_spill] sm:$0xff]  ;;  %v3735_v7 = vld [vmem:[#allocation74_spill] sm:$0xff] }
 0x208   : > { %v3730_v62 = vmov %v3729_v17  ;;  %3733 = vst [vmem:[#allocation166_spill] sm:$0xff] %v3057_v59  ;;  %v3736_v58 = vmov %v3735_v7 }
 0x209   : > { %3722 = vst [vmem:[#allocation161_spill] sm:$0xff] %v3032_v44  ;;  %3724 = vst [vmem:[#allocation163_spill] sm:$0xff] %v3042_v43  ;;  %v3077_v56 = vcombine.low %v3737_v60, %v3736_v58  ;;  %v3745_v58 = vld [vmem:[#allocation144_spill] sm:$0xff] }
 0x20a   : > { %1128 = vmatpush1.bf16.msra.mxu0 %v3017_v51  ;;  %1169 = vmatpush1.bf16.msra.mxu1 %v3022_v52  ;;  %3728 = vst [vmem:[#allocation164_spill] sm:$0xff] %v3047_v57  ;;  %v3731_v51 = vld [vmem:[#allocation69_spill] sm:$0xff] }
 0x20b   : > { %1129 = vmatprep.subr.bf16.mxu0 %v3027_v61  ;;  %1170 = vmatprep.subr.bf16.mxu1 %v3032_v44  ;;  %v3052_v48 = vcombine.high %v3731_v51, %v3729_v17  ;;  %v3062_v47 = vcombine.low %v3731_v51, %v3730_v62  ;;  %v3067_v44 = vcombine.high %v3737_v60, %v3735_v7  ;;  %v3739_v17 = vld [vmem:[#allocation75_spill] sm:$0xff] }
 0x20c   : > { %v3740_v61 = vmov %v3739_v17  ;;  %3743 = vst [vmem:[#allocation170_spill] sm:$0xff] %v3077_v56 }
 0x20d   : > { %3732 = vst [vmem:[#allocation165_spill] sm:$0xff] %v3052_v48  ;;  %3734 = vst [vmem:[#allocation167_spill] sm:$0xff] %v3062_v47 }
 0x20e   : > { %1130 = vmatpush1.bf16.msra.mxu0 %v3037_v55  ;;  %1171 = vmatpush1.bf16.msra.mxu1 %v3042_v43  ;;  %3738 = vst [vmem:[#allocation168_spill] sm:$0xff] %v3067_v44  ;;  %v3741_v55 = vld [vmem:[#allocation73_spill] sm:$0xff] }
 0x20f   : > { %1131 = vmatprep.subr.bf16.mxu0 %v3047_v57  ;;  %1172 = vmatprep.subr.bf16.mxu1 %v3052_v48  ;;  %v3072_v52 = vcombine.high %v3741_v55, %v3739_v17  ;;  %v3082_v51 = vcombine.low %v3741_v55, %v3740_v61 }
 0x211   : > { %3742 = vst [vmem:[#allocation169_spill] sm:$0xff] %v3072_v52  ;;  %3744 = vst [vmem:[#allocation171_spill] sm:$0xff] %v3082_v51 }
 0x212   : > { %1132 = vmatpush1.bf16.msra.mxu0 %v3057_v59  ;;  %1173 = vmatpush1.bf16.msra.mxu1 %v3062_v47 }
 0x213   : > { %1133 = vmatprep.subr.bf16.mxu0 %v3067_v44  ;;  %1174 = vmatprep.subr.bf16.mxu1 %v3072_v52 }
 0x216   : > { %1134 = vmatpush1.bf16.msra.mxu0 %v3077_v56  ;;  %1175 = vmatpush1.bf16.msra.mxu1 %v3082_v51 }
 0x219   : > { %1136 = vmatmul.mubr.bf16.vlgmr.msra.gmra.mrb[4].mxu0 %v2703_v11  ;;  %1177 = vmatmul.mubr.bf16.vlgmr.msra.gmra.mrb[4].mxu1 %v2703_v11 }
 0x2ac   : > { %v710_v7 = vpop.f32.mrb[0].mxu0  ;;  %v751_v17 = vpop.f32.mrb[0].mxu1 }
 0x2ad   : > { %v711_v60 = vadd.f32 %v710_v7, %v3745_v58  ;;  %v712_v62 = vpop.f32.mrb[1].mxu0  ;;  %v753_v63 = vpop.f32.mrb[1].mxu1  ;;  %v752_v11 = vadd.f32 %v751_v17, %v3748_v15 }
 0x2ae   : > { %v713_v55 = vadd.f32 %v712_v62, %v3746_v5  ;;  %v714_v61 = vpop.f32.mrb[2].mxu0  ;;  %v755_v44 = vpop.f32.mrb[2].mxu1  ;;  %v754_v51 = vadd.f32 %v753_v63, %v3747_v24  ;;  %v3750_v63 = vld [vmem:[#allocation121_spill] sm:$0xff] }
 0x2af   : > { %v1754_v47 = vmul.f32 -1.442695, %v711_v60  ;;  %v715_v52 = vpop.f32.mrb[3].mxu0  ;;  %v756_v59 = vpop.f32.mrb[3].mxu1 }
 0x2b0   : > { %v1755_v56 = vmul.f32 -1.442695, %v713_v55  ;;  %v1756_v48 = vmul.f32 -1.442695, %v754_v51 }
 0x2b1   : > { %2056 = vpow2.f32 %v1754_v47 }
 0x2b2   : > { %2058 = vpow2.f32 %v1755_v56 }
 0x2b3   : > { %2060 = vpow2.f32 %v1756_v48 }
 0x2b4   : > { %2062 = vtanh.f32 %v752_v11 }
 0x2bb   : > { %v2057_v57 = vpop.eup %2056 }
 0x2bc   : > { %v2059_v58 = vpop.eup %2058  ;;  %v761_v7 = vadd.f32 1.0, %v2057_v57 }
 0x2bd   : > { %v767_v43 = vadd.f32 1.0, %v2059_v58  ;;  %v2061_v44 = vpop.eup %2060 }
 0x2be   : > { %2064 = vrcp.f32 %v761_v7  ;;  %v2063_v60 = vpop.eup %2062  ;;  %v774_v59 = vadd.f32 1.0, %v2061_v44  ;;  %v3751_v7 = vld [vmem:[#allocation141_spill] sm:$0xff] }
 0x2bf   : > { %2066 = vrcp.f32 %v767_v43 }
 0x2c0   : > { %2068 = vrcp.f32 %v774_v59  ;;  %v3752_v59 = vld [vmem:[#allocation143_spill] sm:$0xff] }
 0x2c8   : > { %v2065_v52 = vpop.eup %2064 }
 0x2c9   : > { %v2067_v55 = vpop.eup %2066  ;;  %v778_v47 = vmul.f32 %v2065_v52, %v2063_v60 }
 0x2ca   : > { %v777_v56 = vmul.f32 %v2228_v6, %v2067_v55  ;;  %v2069_v51 = vpop.eup %2068 }
 0x2cc   : > { %v779_v6 = vadd.f32 %v778_v47, %v777_v56  }
 0x2ce   : > { %2070 = vtanh.f32 %v779_v6 }
 0x2d8   : > { %v2071_v61 = vpop.eup %2070 }
 0x2d9   : > { %v3095_v17 = vmul.f32 %v2071_v61, %v2069_v51  }
 0x2db   : > { %v3749_v48 = vmov %v3095_v17  ;;  %v3753_v17 = vld [vmem:[#allocation142_spill] sm:$0xff] }
 0x2ec   : > { %v1137_v57 = vpop.f32.mrb[4].mxu0  ;;  %v1178_v62 = vpop.f32.mrb[4].mxu1 }
 0x2ed   : > { %v1138_v11 = vadd.f32 %v1137_v57, %v3750_v63  ;;  %v1139_v43 = vpop.f32.mrb[5].mxu0  ;;  %v1180_v58 = vpop.f32.mrb[5].mxu1  ;;  %v1179_v61 = vadd.f32 %v1178_v62, %v3753_v17 }
 0x2ee   : > { %v1140_v5 = vadd.f32 %v1139_v43, %v3751_v7  ;;  %v1141_v44 = vpop.f32.mrb[6].mxu0  ;;  %v1182_v15 = vpop.f32.mrb[6].mxu1  ;;  %v1181_v56 = vadd.f32 %v1180_v58, %v3752_v59 }
 0x2ef   : > { %v1821_v60 = vmul.f32 -1.442695, %v1138_v11  ;;  %v1142_v52 = vpop.f32.mrb[7].mxu0  ;;  %v1183_v55 = vpop.f32.mrb[7].mxu1 }
 0x2f0   : > { %v1822_v47 = vmul.f32 -1.442695, %v1140_v5  ;;  %v1823_v51 = vmul.f32 -1.442695, %v1181_v56 }
 0x2f1   : > { %2072 = vpow2.f32 %v1821_v60 }
 0x2f2   : > { %2074 = vpow2.f32 %v1822_v47 }
 0x2f3   : > { %2076 = vpow2.f32 %v1823_v51 }
 0x2f4   : > { %2078 = vtanh.f32 %v1179_v61 }
 0x2fb   : > { %v2073_v24 = vpop.eup %2072 }
 0x2fc   : > { %v2075_v57 = vpop.eup %2074  ;;  %v1188_v63 = vadd.f32 1.0, %v2073_v24 }
 0x2fd   : > { %v1194_v54 = vadd.f32 1.0, %v2075_v57  ;;  %v2077_v15 = vpop.eup %2076 }
 0x2fe   : > { %2080 = vrcp.f32 %v1188_v63  ;;  %v2079_v11 = vpop.eup %2078  ;;  %v1201_v7 = vadd.f32 1.0, %v2077_v15 }
 0x2ff   : > { %2082 = vrcp.f32 %v1194_v54 }
 0x300   : > { %2084 = vrcp.f32 %v1201_v7 }
 0x308   : > { %v2081_v43 = vpop.eup %2080 }
 0x309   : > { %v2083_v5 = vpop.eup %2082  ;;  %v1205_v44 = vmul.f32 %v2081_v43, %v2079_v11 }
 0x30a   : > { %v1204_v60 = vmul.f32 %v2220_v12, %v2083_v5  ;;  %v2085_v62 = vpop.eup %2084 }
 0x30c   : > { %v3102_v12 = vadd.f32 %v1205_v44, %v1204_v60  }
 0x30e   : > { %v3754_v58 = vmov %v3102_v12 }
 0x30f   : > { %2086 = vtanh.f32 %v3754_v58 }
 0x314   : > { %1212 = sbr.rel (%p1824_p10) target bundleno = 797 (0x31d), region = 44 }
 0x319   : > { %v2087_v52 = vpop.eup %2086 }
 0x31a   : > { %v1208_v24 = vmul.f32 %v2087_v52, %v2085_v62  }
 0x31c   : > { %1216 = vst [vmem:[%s1215_s10] sm:$0x3] %v1208_v24 }
 0x31d PF: > { %s667_s2 = sadd.s32 1, %s2236_s2   ;;  %v3755_v12 = vmov %v3754_v58  ;;  %v3756_v7 = vmov %v1208_v24  ;;  %v3757_v17 = vmov %v3749_v48 }
 0x31e   : > { %p664_p11 = scmp.ge.s32.totalorder %s667_s2, 7  }
 0x31f   :  { %1539 = vmatprep.subr.bf16.mxu0 (%p664_p11), %v2764_v26  ;;  %1580 = vmatprep.subr.bf16.mxu1 (%p664_p11), %v2769_v23  ;;  %v1218_v54 = vpack.c.bf16 (%p664_p11), %v1208_v24, %v1208_v24  ;;  %v3783_v26 = vld [vmem:[#allocation141_spill] sm:$0xff] (%p664_p11)  ;;  %s2245_s11 = smov (%p664_p11), [#allocation8]  }
 0x320   :  { %666 = sbr.rel (!%p664_p11) target bundleno = 408 (0x198), region = 66  ;;  %1540 = vmatpush1.bf16.msra.mxu0 (%p664_p11), %v2775_v10  ;;  %1581 = vmatpush1.bf16.msra.mxu1 (%p664_p11), %v2780_v3  ;;  %s1652_s12 = sshll.u32 (%p664_p11), %s2245_s11, 4  ;;  %s1653_s12 = int_to_ptr.vmem [resolvable:$true] %s1652_s12 }
 0x321   :  { %1541 = vmatprep.subr.bf16.mxu0 (%p664_p11), %v2785_v0  ;;  %1582 = vmatprep.subr.bf16.mxu1 (%p664_p11), %v2790_v18  ;;  %v3759_v18 = vld [vmem:[#allocation149_spill] sm:$0xff] (%p664_p11)  ;;  %s2170_s13 = scalar_lea.vmem (%p664_p11), %s1653_s12, 128  ;;  %p2175_p13 = scmp.lt.s32.totalorder (%p664_p11), %s1653_s12, %s1653_s12 }
 0x322   :  { %1571 = vmatprep.mubr.bf16.mxu0 (%p664_p11), %v1218_v54  ;;  %1612 = vmatprep.mubr.bf16.mxu1 (%p664_p11), %v1218_v54  ;;  %v3782_v0 = vld [vmem:[#allocation121_spill] sm:$0xff] (%p664_p11)  ;;  %p2171_p12 = scmp.ne.s32.totalorder (%p664_p11), %s1653_s12, %s2170_s13  ;;  %p2176_p0 = scmp.lt.s32.totalorder (%p664_p11), %s2170_s13, %s2170_s13 }
 0x324   :  { %1542 = vmatpush1.bf16.msra.mxu0 (%p664_p11), %v2797_v14  ;;  %1583 = vmatpush1.bf16.msra.mxu1 (%p664_p11), %v2802_v1  ;;  %p2177_p1 = por (%p664_p11), %p2176_p0, %p2175_p13 }
 0x325   :  { %1543 = vmatprep.subr.bf16.mxu0 (%p664_p11), %v2807_v20  ;;  %1584 = vmatprep.subr.bf16.mxu1 (%p664_p11), %v2812_v25  ;;  %v3760_v20 = vld [vmem:[#allocation150_spill] sm:$0xff] (%p664_p11)  ;;  %v3763_v25 = vld [vmem:[#allocation153_spill] sm:$0xff] (%p664_p11) }
 0x326   :  { %p2178_p2 = pnand (%p664_p11), %p2177_p1, %p2171_p12 }
 0x328   :  { %1544 = vmatpush1.bf16.msra.mxu0 %v2817_v4  ;;  %1585 = vmatpush1.bf16.msra.mxu1 %v2822_v8  ;;  %v3784_v8 = vld [vmem:[#allocation143_spill] sm:$0xff] }
 0x329   :  { %1545 = vmatprep.subr.bf16.mxu0 %v3645_v27  ;;  %1586 = vmatprep.subr.bf16.mxu1 %v2832_v29  ;;  %v3764_v27 = vld [vmem:[#allocation154_spill] sm:$0xff]  ;;  %v3766_v29 = vld [vmem:[#allocation156_spill] sm:$0xff] }
 0x32c   :  { %1546 = vmatpush1.bf16.msra.mxu0 %v2837_v2  ;;  %1587 = vmatpush1.bf16.msra.mxu1 %v2842_v16 }
 0x32d   :  { %1547 = vmatprep.subr.bf16.mxu0 %v2847_v30  ;;  %1588 = vmatprep.subr.bf16.mxu1 %v2852_v33  ;;  %v3767_v30 = vld [vmem:[#allocation157_spill] sm:$0xff]  ;;  %v3770_v33 = vld [vmem:[#allocation160_spill] sm:$0xff] }
 0x330   :  { %1548 = vmatpush1.bf16.msra.mxu0 %v2857_v13  ;;  %1589 = vmatpush1.bf16.msra.mxu1 %v2862_v9  ;;  %v3758_v13 = vld [vmem:[#allocation148_spill] sm:$0xff] }
 0x331   :  { %1549 = vmatprep.subr.bf16.mxu0 %v2867_v34  ;;  %1590 = vmatprep.subr.bf16.mxu1 %v2872_v37  ;;  %v3771_v34 = vld [vmem:[#allocation161_spill] sm:$0xff]  ;;  %v3774_v37 = vld [vmem:[#allocation164_spill] sm:$0xff] }
 0x334   :  { %1550 = vmatpush1.bf16.msra.mxu0 %v2877_v21  ;;  %1591 = vmatpush1.bf16.msra.mxu1 %v2882_v22  ;;  %v3761_v21 = vld [vmem:[#allocation151_spill] sm:$0xff]  ;;  %v3762_v22 = vld [vmem:[#allocation152_spill] sm:$0xff] }
 0x335   :  { %1551 = vmatprep.subr.bf16.mxu0 %v2887_v38  ;;  %1592 = vmatprep.subr.bf16.mxu1 %v2892_v41  ;;  %v3775_v38 = vld [vmem:[#allocation165_spill] sm:$0xff]  ;;  %v3778_v41 = vld [vmem:[#allocation168_spill] sm:$0xff] }
 0x338   :  { %1552 = vmatpush1.bf16.msra.mxu0 %v2897_v19  ;;  %1593 = vmatpush1.bf16.msra.mxu1 %v2902_v28  ;;  %v3765_v28 = vld [vmem:[#allocation155_spill] sm:$0xff] }
 0x339   :  { %1553 = vmatprep.subr.bf16.mxu0 %v2907_v42  ;;  %1594 = vmatprep.subr.bf16.mxu1 %v2912_v45  ;;  %v3779_v42 = vld [vmem:[#allocation169_spill] sm:$0xff]  ;;  %v1217_v45 = vpack.c.bf16 %v3749_v48, %v3749_v48  ;;  %v3785_v48 = vld [vmem:[#allocation142_spill] sm:$0xff] }
 0x33c   :  { %1554 = vmatpush1.bf16.msra.mxu0 %v2917_v31  ;;  %1595 = vmatpush1.bf16.msra.mxu1 %v2922_v32  ;;  %v3768_v31 = vld [vmem:[#allocation158_spill] sm:$0xff]  ;;  %v3769_v32 = vld [vmem:[#allocation159_spill] sm:$0xff] }
 0x33d   :  { %1555 = vmatprep.subr.bf16.mxu0 %v2927_v46  ;;  %1596 = vmatprep.subr.bf16.mxu1 %v2932_v49  ;;  %v3780_v46 = vld [vmem:[#allocation170_spill] sm:$0xff]  ;;  %v3781_v49 = vld [vmem:[#allocation171_spill] sm:$0xff] }
 0x340   :  { %1556 = vmatpush1.bf16.msra.mxu0 %v2937_v35  ;;  %1597 = vmatpush1.bf16.msra.mxu1 %v2942_v36  ;;  %v3772_v35 = vld [vmem:[#allocation162_spill] sm:$0xff]  ;;  %v3773_v36 = vld [vmem:[#allocation163_spill] sm:$0xff] }
 0x341   :  { %1557 = vmatprep.subr.bf16.mxu0 %v2947_v50  ;;  %1598 = vmatprep.subr.bf16.mxu1 %v2952_v53 }
 0x344   :  { %1558 = vmatpush1.bf16.msra.mxu0 %v2957_v39  ;;  %1599 = vmatpush1.bf16.msra.mxu1 %v2962_v40  ;;  %v3776_v39 = vld [vmem:[#allocation166_spill] sm:$0xff]  ;;  %v3777_v40 = vld [vmem:[#allocation167_spill] sm:$0xff] }
 0x345   :  { %1559 = vmatprep.subr.bf16.mxu0 %v3758_v13  ;;  %1600 = vmatprep.subr.bf16.mxu1 %v3759_v18 }
 0x348   :  { %1560 = vmatpush1.bf16.msra.mxu0 %v3760_v20  ;;  %1601 = vmatpush1.bf16.msra.mxu1 %v3761_v21 }
 0x349   :  { %1561 = vmatprep.subr.bf16.mxu0 %v3762_v22  ;;  %1602 = vmatprep.subr.bf16.mxu1 %v3763_v25 }
 0x34c   :  { %1562 = vmatpush1.bf16.msra.mxu0 %v3764_v27  ;;  %1603 = vmatpush1.bf16.msra.mxu1 %v3765_v28 }
 0x34d   :  { %1563 = vmatprep.subr.bf16.mxu0 %v3766_v29  ;;  %1604 = vmatprep.subr.bf16.mxu1 %v3767_v30 }
 0x350   :  { %1564 = vmatpush1.bf16.msra.mxu0 %v3768_v31  ;;  %1605 = vmatpush1.bf16.msra.mxu1 %v3769_v32 }
 0x351   :  { %1565 = vmatprep.subr.bf16.mxu0 %v3770_v33  ;;  %1606 = vmatprep.subr.bf16.mxu1 %v3771_v34 }
 0x354   :  { %1566 = vmatpush1.bf16.msra.mxu0 %v3772_v35  ;;  %1607 = vmatpush1.bf16.msra.mxu1 %v3773_v36 }
 0x355   :  { %1567 = vmatprep.subr.bf16.mxu0 %v3774_v37  ;;  %1608 = vmatprep.subr.bf16.mxu1 %v3775_v38 }
 0x358   :  { %1568 = vmatpush1.bf16.msra.mxu0 %v3776_v39  ;;  %1609 = vmatpush1.bf16.msra.mxu1 %v3777_v40 }
 0x359   :  { %1569 = vmatprep.subr.bf16.mxu0 %v3778_v41  ;;  %1610 = vmatprep.subr.bf16.mxu1 %v3779_v42 }
 0x35c   :  { %1570 = vmatpush1.bf16.msra.mxu0 %v3780_v46  ;;  %1611 = vmatpush1.bf16.msra.mxu1 %v3781_v49 }
 0x35f   :  { %1572 = vmatmul.mubr.bf16.vlgmr.msra.gmra.mrb[0].mxu0 %v1217_v45  ;;  %1613 = vmatmul.mubr.bf16.vlgmr.msra.gmra.mrb[0].mxu1 %v1217_v45 }
 0x432   :  { %v1573_v50 = vpop.f32.mrb[0].mxu0  ;;  %v1614_v53 = vpop.f32.mrb[0].mxu1 }
 0x433   :  { %v1574_v6 = vadd.f32 %v1573_v50, %v3782_v0  ;;  %v1575_v12 = vpop.f32.mrb[1].mxu0  ;;  %v1616_v16 = vpop.f32.mrb[1].mxu1  ;;  %v1615_v55 = vadd.f32 %v1614_v53, %v3785_v48 }
 0x434   :  { %v1576_v2 = vadd.f32 %v1575_v12, %v3783_v26  ;;  %v1577_v1 = vpop.f32.mrb[2].mxu0  ;;  %v1618_v23 = vpop.f32.mrb[2].mxu1  ;;  %v1617_v14 = vadd.f32 %v1616_v16, %v3784_v8 }
 0x435   :  { %v1891_v10 = vmul.f32 -1.442695, %v1574_v6  ;;  %v1578_v3 = vpop.f32.mrb[3].mxu0  ;;  %v1619_v4 = vpop.f32.mrb[3].mxu1 }
 0x436   :  { %v1892_v19 = vmul.f32 -1.442695, %v1576_v2  ;;  %v1893_v9 = vmul.f32 -1.442695, %v1617_v14 }
 0x437   :  { %2088 = vpow2.f32 %v1891_v10 }
 0x438   :  { %2090 = vpow2.f32 %v1892_v19 }
 0x439   :  { %2092 = vpow2.f32 %v1893_v9 }
 0x43a   :  { %2094 = vtanh.f32 %v1615_v55 }
 0x441   :  { %v2089_v47 = vpop.eup %2088 }
 0x442   :  { %v2091_v59 = vpop.eup %2090  ;;  %v1624_v56 = vadd.f32 1.0, %v2089_v47 }
 0x443   :  { %v1630_v51 = vadd.f32 1.0, %v2091_v59  ;;  %v2093_v17 = vpop.eup %2092 }
 0x444   :  { %2096 = vrcp.f32 %v1624_v56  ;;  %v2095_v61 = vpop.eup %2094  ;;  %v1637_v63 = vadd.f32 1.0, %v2093_v17 }
 0x445   :  { %2098 = vrcp.f32 %v1630_v51 }
 0x446   :  { %2100 = vrcp.f32 %v1637_v63 }
 0x44e   :  { %v2097_v57 = vpop.eup %2096 }
 0x44f   :  { %v2099_v15 = vpop.eup %2098  ;;  %v1641_v11 = vmul.f32 %v2097_v57, %v2095_v61 }
 0x450   :  { %v1640_v43 = vmul.f32 %v2099_v15, %v3754_v58  ;;  %v2101_v5 = vpop.eup %2100 }
 0x452   :  { %v1642_v7 = vadd.f32 %v1641_v11, %v1640_v43 }
 0x454   :  { %2102 = vtanh.f32 %v1642_v7 }
 0x45e   :  { %v2103_v44 = vpop.eup %2102 }
 0x45f   :  { %v1644_v60 = vmul.f32 %v2103_v44, %v2101_v5 }
 0x461   :  { %1646 = vst [vmem:[#allocation8 + $0x6] sm:$0x3] %v1644_v60 }
 0x462   :  { %2181 = shalt.err (!%p2178_p2)
}
 0x463   :  { %s2182_s16 = scalar_lea.hbm %s3208_s5, 128 }
 0x464   :  { %p2183_p3 = scmp.ne.s32.totalorder %s3208_s5, %s2182_s16  ;;  %p2186_p4 = scmp.lt.u32.totalorder %s2182_s16, %s3208_s5 }
 0x466   :  { %p2188_p5 = pnand %p2186_p4, %p2183_p3 }
 0x468   :  { %2191 = shalt.err (!%p2188_p5)
}
 0x469   :  { %s2246_s20 = smov 32   ;;  %s2247_s21 = smov 2  }
 0x46a   :  { %1658 = dma.vmem_to_hbm [thread:$0]  %s1653_s12, 128, %s3208_s5, [#allocation4], %s2246_s20, %s2246_s20, %s2247_s21  }
 0x46b   :  { %2216 = dma.done.wait [#allocation4], 128  }
 0x46c   :  { %2217 = vsyncadd [#allocation4], 4294967168 }
 0x46d   :  { %1662 = vsyncpa [#allocation3], 1 }
 0x46e   :  { %1663 = vsyncpa [#allocation6], 1 }
 0x46f   :  { %1664 = vsyncpa [#allocation4], 1 }

</bundles_post_ra>
